<compile_context>
chip_gen: v5e
topology: v5e:2x2
jax: 0.10.0
libtpu: 0.0.40
codegen_flags: <defaults>
</compile_context>

<pallas_src>
import math

import jax
import jax.numpy as jnp
from jax.experimental import pallas as pl
from jax.experimental.pallas import tpu as pltpu

# ----------------------------- configuration --------------------------------
B, T, C = 2, 8, 32           # batch, time, hidden_size
H = 2                        # attention heads
D = C // H                   # head dim
FFN = 64                     # position-wise FFN hidden size
L = 2                        # number of decoder layers (arch = [1, 1])
PADDING_IDX = 0
MAX_POS = 2000               # DEFAULT_MAX_TARGET_POSITIONS
EPS = 1e-5                   # nn.LayerNorm default eps
NEG_INF = -1e30              # additive key-padding mask value

WEIGHT_KEYS = [
    "ln1_g", "ln1_b", "wqkv", "bqkv", "wo", "bo",
    "ln2_g", "ln2_b", "w1", "b1", "w2", "b2",
    "lnf_g", "lnf_b",
]


# --------------------------- shared forward math ----------------------------
def _layer_norm(x, g, b):
    mu = jnp.mean(x, axis=-1, keepdims=True)
    var = jnp.mean((x - mu) ** 2, axis=-1, keepdims=True)
    return (x - mu) * jax.lax.rsqrt(var + EPS) * g + b


# ------------------------------- Pallas kernel -------------------------------
def decoder_kernel(alpha_ref, x_ref, pos_ref,
                   ln1g_ref, ln1b_ref, wqkv_ref, bqkv_ref, wo_ref, bo_ref,
                   ln2g_ref, ln2b_ref, w1_ref, b1_ref, w2_ref, b2_ref,
                   lnfg_ref, lnfb_ref, o_ref):
    x = x_ref[...].astype(jnp.float32)                          # [B*T, C]
    alpha = alpha_ref[0]                                        # SMEM scalar

    # padding mask from the RAW input (before positional add), per PyTorch.
    nonpad = (jnp.sum(jnp.abs(x), axis=-1, keepdims=True) != 0.0)   # [B*T, 1]
    nonpad_f = nonpad.astype(jnp.float32)

    # per-batch additive key-padding bias, lane-oriented [1, T]
    key_bias = []
    for b in range(B):
        nb = nonpad[b * T:(b + 1) * T]                          # [T, 1]
        key_bias.append(jnp.where(nb, 0.0, NEG_INF).reshape(1, T))

    # x = x + pos_embed_alpha * positions ; dropout -> identity (inference)
    x = x + alpha * pos_ref[...].astype(jnp.float32)

    scale = 1.0 / math.sqrt(D)
    for l in range(L):
        # ---- multi-head self-attention sub-layer (pre-LN) ----
        h = _layer_norm(x, ln1g_ref[l], ln1b_ref[l])            # [B*T, C]
        qkv = jnp.dot(h, wqkv_ref[l],
                      preferred_element_type=jnp.float32) + bqkv_ref[l]  # [B*T, 3C]
        q = qkv[:, 0:C]
        k = qkv[:, C:2 * C]
        v = qkv[:, 2 * C:3 * C]
        wo = wo_ref[l]                                          # [C, C]

        rows = []
        for b in range(B):
            rs = slice(b * T, (b + 1) * T)
            acc = jnp.zeros((T, C), jnp.float32)
            for hh in range(H):
                cs = slice(hh * D, (hh + 1) * D)
                s = jnp.dot(q[rs, cs], k[rs, cs].T,
                            preferred_element_type=jnp.float32) * scale   # [T, T]
                s = s + key_bias[b]
                s = s - jnp.max(s, axis=-1, keepdims=True)
                p = jnp.exp(s)
                # denom >= 1 always (row max gives exp(0)=1) -> no 0/0.
                p = p * pl.reciprocal(jnp.sum(p, axis=-1, keepdims=True),
                                      approx=True)
                ctx = jnp.dot(p, v[rs, cs],
                              preferred_element_type=jnp.float32)          # [T, D]
                # project this head's slice of W_o and accumulate (no concat)
                acc = acc + jnp.dot(ctx, wo[cs, :],
                                    preferred_element_type=jnp.float32)    # [T, C]
            rows.append(acc)
        attn = jnp.concatenate(rows, axis=0) + bo_ref[l]        # [B*T, C]
        x = (x + attn) * nonpad_f

        # ---- position-wise feed-forward sub-layer (pre-LN) ----
        h = _layer_norm(x, ln2g_ref[l], ln2b_ref[l])
        h = jnp.dot(h, w1_ref[l], preferred_element_type=jnp.float32) + b1_ref[l]
        h = jnp.maximum(h, 0.0)
        h = jnp.dot(h, w2_ref[l], preferred_element_type=jnp.float32) + b2_ref[l]
        x = (x + h) * nonpad_f

    # final LayerNorm
    o_ref[...] = _layer_norm(x, lnfg_ref[...], lnfb_ref[...]).astype(o_ref.dtype)


def fastspeech_decoder(x, params):
    """x: [B, T, C] float32 -> [B, T, C] float32."""
    pos_emb = positional_embedding(x)                           # [B, T, C]
    x_flat = x.reshape(B * T, C).astype(jnp.float32)
    pos_flat = pos_emb.reshape(B * T, C).astype(jnp.float32)
    weights = [params[k] for k in WEIGHT_KEYS]

    smem = pl.BlockSpec(memory_space=pltpu.MemorySpace.SMEM)
    vmem = pl.BlockSpec(memory_space=pltpu.MemorySpace.VMEM)
    in_specs = [smem, vmem, vmem] + [vmem] * len(weights)

    out = pl.pallas_call(
        decoder_kernel,
        out_shape=jax.ShapeDtypeStruct((B * T, C), jnp.float32),
        in_specs=in_specs,
        out_specs=pl.BlockSpec(memory_space=pltpu.MemorySpace.VMEM),
    )(params["alpha"], x_flat, pos_flat, *weights)
    return out.reshape(B, T, C)


# ------------------------- positional embedding glue -------------------------
def sinusoidal_table(num_emb, dim, padding_idx):
    half = dim // 2
    scale = math.log(10000.0) / (half - 1)
    freqs = jnp.exp(jnp.arange(half, dtype=jnp.float32) * -scale)
    args = jnp.arange(num_emb, dtype=jnp.float32)[:, None] * freqs[None, :]
    table = jnp.concatenate([jnp.sin(args), jnp.cos(args)], axis=1)
    if dim % 2 == 1:
        table = jnp.concatenate([table, jnp.zeros((num_emb, 1), jnp.float32)], axis=1)
    table = table.at[padding_idx].set(0.0)
    return table


def positional_embedding(x):
    # SinusoidalPositionalEmbedding(x[..., 0]) with fairseq make_positions.
    first = x[..., 0]                                           # [B, T]
    mask = (first != float(PADDING_IDX)).astype(jnp.int32)
    positions = jnp.cumsum(mask, axis=1) * mask + PADDING_IDX
    table = sinusoidal_table(MAX_POS + PADDING_IDX + 1, C, PADDING_IDX)
    return table[positions]                                     # [B, T, C]


# -------------------------------- parameters ---------------------------------
def init_params(key):
    ks = jax.random.split(key, 6)

    def nrm(k, shape, s=0.05):
        return jax.random.normal(k, shape, jnp.float32) * s

    return dict(
        alpha=jnp.ones((1,), jnp.float32),                      # pos_embed_alpha
        ln1_g=jnp.ones((L, 1, C), jnp.float32), ln1_b=jnp.zeros((L, 1, C), jnp.float32),
        wqkv=nrm(ks[0], (L, C, 3 * C)), bqkv=jnp.zeros((L, 1, 3 * C), jnp.float32),
        wo=nrm(ks[1], (L, C, C)), bo=jnp.zeros((L, 1, C), jnp.float32),
        ln2_g=jnp.ones((L, 1, C), jnp.float32), ln2_b=jnp.zeros((L, 1, C), jnp.float32),
        w1=nrm(ks[2], (L, C, FFN)), b1=nrm(ks[3], (L, 1, FFN), 0.01),
        w2=nrm(ks[4], (L, FFN, C)), b2=nrm(ks[5], (L, 1, C), 0.01),
        lnf_g=jnp.ones((1, C), jnp.float32), lnf_b=jnp.zeros((1, C), jnp.float32),
    )


# ------------------------------ pure-JAX reference ---------------------------
def ref_forward(x, params):
    pos_emb = positional_embedding(x)
    alpha = params["alpha"][0]
    nonpad = (jnp.sum(jnp.abs(x), axis=-1, keepdims=True) != 0.0)       # [B,T,1]
    nonpad_f = nonpad.astype(jnp.float32)
    key_bias = jnp.where(nonpad, 0.0, NEG_INF).transpose(0, 2, 1)       # [B,1,T]

    h = x.astype(jnp.float32) + alpha * pos_emb
    scale = 1.0 / math.sqrt(D)
    for l in range(L):
        y = _layer_norm(h, params["ln1_g"][l], params["ln1_b"][l])
        qkv = y @ params["wqkv"][l] + params["bqkv"][l]                 # [B,T,3C]
        q, k, v = qkv[..., :C], qkv[..., C:2 * C], qkv[..., 2 * C:]
        qh = q.reshape(B, T, H, D).transpose(0, 2, 1, 3)                # [B,H,T,D]
        kh = k.reshape(B, T, H, D).transpose(0, 2, 1, 3)
        vh = v.reshape(B, T, H, D).transpose(0, 2, 1, 3)
        s = jnp.einsum("bhqd,bhkd->bhqk", qh, kh) * scale + key_bias[:, None]
        p = jax.nn.softmax(s, axis=-1)
        ctx = jnp.einsum("bhqk,bhkd->bhqd", p, vh)
        ctx = ctx.transpose(0, 2, 1, 3).reshape(B, T, C)
        attn = ctx @ params["wo"][l] + params["bo"][l]
        h = (h + attn) * nonpad_f

        y = _layer_norm(h, params["ln2_g"][l], params["ln2_b"][l])
        ffn = jnp.maximum(y @ params["w1"][l] + params["b1"][l], 0.0)
        ffn = ffn @ params["w2"][l] + params["b2"][l]
        h = (h + ffn) * nonpad_f
    return _layer_norm(h, params["lnf_g"], params["lnf_b"])


# ------------------------------------ main ------------------------------------
if __name__ == "__main__":
    key = jax.random.PRNGKey(0)
    kx, kp = jax.random.split(key)

    x = jax.random.normal(kx, (B, T, C), jnp.float32)
    x = x.at[:, T - 2:, :].set(0.0)        # last two frames are padding (mask path)
    params = init_params(kp)

    out = jax.block_until_ready(fastspeech_decoder(x, params))
    ref = ref_forward(x, params)

    assert out.shape == (B, T, C)
    assert bool(jnp.all(jnp.isfinite(out)))
    # kernel uses EUP approx reciprocal in softmax -> slightly relaxed tolerance
    err = float(jnp.max(jnp.abs(out - ref)))
    assert bool(jnp.allclose(out, ref, atol=2e-3, rtol=2e-3)), err

    print("KERNEL_OK")
</pallas_src>

<mosaic_0001>
module attributes {stable_mosaic.version = 11 : i64} {
  func.func @decoder_kernel(%arg0: memref<1xf32, #tpu.memory_space<smem>>, %arg1: memref<16x32xf32, #tpu.memory_space<vmem>>, %arg2: memref<16x32xf32, #tpu.memory_space<vmem>>, %arg3: memref<2x1x32xf32, #tpu.memory_space<vmem>>, %arg4: memref<2x1x32xf32, #tpu.memory_space<vmem>>, %arg5: memref<2x32x96xf32, #tpu.memory_space<vmem>>, %arg6: memref<2x1x96xf32, #tpu.memory_space<vmem>>, %arg7: memref<2x32x32xf32, #tpu.memory_space<vmem>>, %arg8: memref<2x1x32xf32, #tpu.memory_space<vmem>>, %arg9: memref<2x1x32xf32, #tpu.memory_space<vmem>>, %arg10: memref<2x1x32xf32, #tpu.memory_space<vmem>>, %arg11: memref<2x32x64xf32, #tpu.memory_space<vmem>>, %arg12: memref<2x1x64xf32, #tpu.memory_space<vmem>>, %arg13: memref<2x64x32xf32, #tpu.memory_space<vmem>>, %arg14: memref<2x1x32xf32, #tpu.memory_space<vmem>>, %arg15: memref<1x32xf32, #tpu.memory_space<vmem>>, %arg16: memref<1x32xf32, #tpu.memory_space<vmem>>, %arg17: memref<16x32xf32, #tpu.memory_space<vmem>>) attributes {dimension_semantics = [], scalar_prefetch = 0 : i64, scratch_operands = 0 : i64, tpu.core_type = #tpu.core_type<tc>} {
    %c0 = arith.constant 0 : index
    %c0_0 = arith.constant 0 : index
    %0 = vector.load %arg1[%c0, %c0_0] : memref<16x32xf32, #tpu.memory_space<vmem>>, vector<16x32xf32>
    %c0_1 = arith.constant 0 : index
    %1 = memref.load %arg0[%c0_1] : memref<1xf32, #tpu.memory_space<smem>>
    %2 = math.absf %0 : vector<16x32xf32>
    %cst = arith.constant dense<0.000000e+00> : vector<16xf32>
    %3 = vector.multi_reduction <add>, %2, %cst [1] : vector<16x32xf32> to vector<16xf32>
    %4 = vector.shape_cast %3 : vector<16xf32> to vector<16x1xf32>
    %cst_2 = arith.constant 0.000000e+00 : f32
    %5 = vector.broadcast %cst_2 : f32 to vector<16x1xf32>
    %6 = arith.cmpf one, %4, %5 : vector<16x1xf32>
    %7 = arith.extui %6 : vector<16x1xi1> to vector<16x1xi32>
    %8 = arith.sitofp %7 : vector<16x1xi32> to vector<16x1xf32>
    %9 = vector.extract_strided_slice %6 {offsets = [0, 0], sizes = [8, 1], strides = [1, 1]} : vector<16x1xi1> to vector<8x1xi1>
    %cst_3 = arith.constant 0.000000e+00 : f32
    %cst_4 = arith.constant -1.000000e+30 : f32
    %10 = vector.broadcast %cst_3 : f32 to vector<8x1xf32>
    %11 = vector.broadcast %cst_4 : f32 to vector<8x1xf32>
    %12 = arith.select %9, %10, %11 : vector<8x1xi1>, vector<8x1xf32>
    %13 = vector.shape_cast %12 : vector<8x1xf32> to vector<1x8xf32>
    %14 = vector.extract_strided_slice %6 {offsets = [8, 0], sizes = [8, 1], strides = [1, 1]} : vector<16x1xi1> to vector<8x1xi1>
    %cst_5 = arith.constant 0.000000e+00 : f32
    %cst_6 = arith.constant -1.000000e+30 : f32
    %15 = vector.broadcast %cst_5 : f32 to vector<8x1xf32>
    %16 = vector.broadcast %cst_6 : f32 to vector<8x1xf32>
    %17 = arith.select %14, %15, %16 : vector<8x1xi1>, vector<8x1xf32>
    %18 = vector.shape_cast %17 : vector<8x1xf32> to vector<1x8xf32>
    %c0_7 = arith.constant 0 : index
    %c0_8 = arith.constant 0 : index
    %19 = vector.load %arg2[%c0_7, %c0_8] : memref<16x32xf32, #tpu.memory_space<vmem>>, vector<16x32xf32>
    %20 = vector.broadcast %1 : f32 to vector<16x32xf32>
    %21 = arith.mulf %20, %19 : vector<16x32xf32>
    %22 = arith.addf %0, %21 : vector<16x32xf32>
    %c0_9 = arith.constant 0 : index
    %c0_10 = arith.constant 0 : index
    %c0_11 = arith.constant 0 : index
    %23 = vector.load %arg3[%c0_9, %c0_10, %c0_11] : memref<2x1x32xf32, #tpu.memory_space<vmem>>, vector<1x1x32xf32>
    %24 = vector.shape_cast %23 : vector<1x1x32xf32> to vector<1x32xf32>
    %c0_12 = arith.constant 0 : index
    %c0_13 = arith.constant 0 : index
    %c0_14 = arith.constant 0 : index
    %25 = vector.load %arg4[%c0_12, %c0_13, %c0_14] : memref<2x1x32xf32, #tpu.memory_space<vmem>>, vector<1x1x32xf32>
    %26 = vector.shape_cast %25 : vector<1x1x32xf32> to vector<1x32xf32>
    %cst_15 = arith.constant dense<0.000000e+00> : vector<16xf32>
    %27 = vector.multi_reduction <add>, %22, %cst_15 [1] : vector<16x32xf32> to vector<16xf32>
    %28 = vector.shape_cast %27 : vector<16xf32> to vector<16x1xf32>
    %cst_16 = arith.constant 3.200000e+01 : f32
    %29 = vector.broadcast %cst_16 : f32 to vector<16x1xf32>
    %30 = arith.divf %28, %29 : vector<16x1xf32>
    %31 = vector.broadcast %30 : vector<16x1xf32> to vector<16x32xf32>
    %32 = arith.subf %22, %31 : vector<16x32xf32>
    %33 = arith.mulf %32, %32 : vector<16x32xf32>
    %cst_17 = arith.constant dense<0.000000e+00> : vector<16xf32>
    %34 = vector.multi_reduction <add>, %33, %cst_17 [1] : vector<16x32xf32> to vector<16xf32>
    %35 = vector.shape_cast %34 : vector<16xf32> to vector<16x1xf32>
    %cst_18 = arith.constant 3.200000e+01 : f32
    %36 = vector.broadcast %cst_18 : f32 to vector<16x1xf32>
    %37 = arith.divf %35, %36 : vector<16x1xf32>
    %38 = vector.broadcast %30 : vector<16x1xf32> to vector<16x32xf32>
    %39 = arith.subf %22, %38 : vector<16x32xf32>
    %cst_19 = arith.constant 9.99999974E-6 : f32
    %40 = vector.broadcast %cst_19 : f32 to vector<16x1xf32>
    %41 = arith.addf %37, %40 : vector<16x1xf32>
    %42 = math.rsqrt %41 : vector<16x1xf32>
    %43 = vector.broadcast %42 : vector<16x1xf32> to vector<16x32xf32>
    %44 = arith.mulf %39, %43 : vector<16x32xf32>
    %45 = vector.broadcast %24 : vector<1x32xf32> to vector<16x32xf32>
    %46 = arith.mulf %44, %45 : vector<16x32xf32>
    %47 = vector.broadcast %26 : vector<1x32xf32> to vector<16x32xf32>
    %48 = arith.addf %46, %47 : vector<16x32xf32>
    %c0_20 = arith.constant 0 : index
    %c0_21 = arith.constant 0 : index
    %c0_22 = arith.constant 0 : index
    %49 = vector.load %arg5[%c0_20, %c0_21, %c0_22] : memref<2x32x96xf32, #tpu.memory_space<vmem>>, vector<1x32x96xf32>
    %50 = vector.shape_cast %49 : vector<1x32x96xf32> to vector<32x96xf32>
    %cst_23 = arith.constant dense<0.000000e+00> : vector<16x96xf32>
    %51 = tpu.matmul %48, %50, %cst_23 {dimension_numbers = #tpu.dot_dimension_numbers<[1], [0], [0], [1], [0, 0, 1, 1], [], []>} : vector<16x32xf32>, vector<32x96xf32>, vector<16x96xf32> -> vector<16x96xf32>
    %c0_24 = arith.constant 0 : index
    %c0_25 = arith.constant 0 : index
    %c0_26 = arith.constant 0 : index
    %52 = vector.load %arg6[%c0_24, %c0_25, %c0_26] : memref<2x1x96xf32, #tpu.memory_space<vmem>>, vector<1x1x96xf32>
    %53 = vector.shape_cast %52 : vector<1x1x96xf32> to vector<1x96xf32>
    %54 = vector.broadcast %53 : vector<1x96xf32> to vector<16x96xf32>
    %55 = arith.addf %51, %54 : vector<16x96xf32>
    %56 = vector.extract_strided_slice %55 {offsets = [0, 0], sizes = [16, 32], strides = [1, 1]} : vector<16x96xf32> to vector<16x32xf32>
    %57 = vector.extract_strided_slice %55 {offsets = [0, 32], sizes = [16, 32], strides = [1, 1]} : vector<16x96xf32> to vector<16x32xf32>
    %58 = vector.extract_strided_slice %55 {offsets = [0, 64], sizes = [16, 32], strides = [1, 1]} : vector<16x96xf32> to vector<16x32xf32>
    %c0_27 = arith.constant 0 : index
    %c0_28 = arith.constant 0 : index
    %c0_29 = arith.constant 0 : index
    %59 = vector.load %arg7[%c0_27, %c0_28, %c0_29] : memref<2x32x32xf32, #tpu.memory_space<vmem>>, vector<1x32x32xf32>
    %60 = vector.shape_cast %59 : vector<1x32x32xf32> to vector<32x32xf32>
    %cst_30 = arith.constant 0.000000e+00 : f32
    %61 = vector.broadcast %cst_30 : f32 to vector<8x32xf32>
    %62 = vector.extract_strided_slice %56 {offsets = [0, 0], sizes = [8, 16], strides = [1, 1]} : vector<16x32xf32> to vector<8x16xf32>
    %63 = vector.extract_strided_slice %57 {offsets = [0, 0], sizes = [8, 16], strides = [1, 1]} : vector<16x32xf32> to vector<8x16xf32>
    %64 = tpu.transpose %63, [1, 0] : vector<8x16xf32> -> vector<16x8xf32>
    %cst_31 = arith.constant dense<0.000000e+00> : vector<8x8xf32>
    %65 = tpu.matmul %62, %64, %cst_31 {dimension_numbers = #tpu.dot_dimension_numbers<[1], [0], [0], [1], [0, 0, 1, 1], [], []>} : vector<8x16xf32>, vector<16x8xf32>, vector<8x8xf32> -> vector<8x8xf32>
    %cst_32 = arith.constant 2.500000e-01 : f32
    %66 = vector.broadcast %cst_32 : f32 to vector<8x8xf32>
    %67 = arith.mulf %65, %66 : vector<8x8xf32>
    %68 = vector.broadcast %13 : vector<1x8xf32> to vector<8x8xf32>
    %69 = arith.addf %67, %68 : vector<8x8xf32>
    %cst_33 = arith.constant dense<0xFF800000> : vector<8xf32>
    %70 = vector.multi_reduction <maximumf>, %69, %cst_33 [1] : vector<8x8xf32> to vector<8xf32>
    %71 = vector.shape_cast %70 : vector<8xf32> to vector<8x1xf32>
    %72 = vector.broadcast %71 : vector<8x1xf32> to vector<8x8xf32>
    %73 = arith.subf %69, %72 : vector<8x8xf32>
    %74 = math.exp %73 : vector<8x8xf32>
    %cst_34 = arith.constant dense<0.000000e+00> : vector<8xf32>
    %75 = vector.multi_reduction <add>, %74, %cst_34 [1] : vector<8x8xf32> to vector<8xf32>
    %76 = vector.shape_cast %75 : vector<8xf32> to vector<8x1xf32>
    %77 = tpu.reciprocal %76 {approx = true} : vector<8x1xf32> -> vector<8x1xf32>
    %78 = vector.broadcast %77 : vector<8x1xf32> to vector<8x8xf32>
    %79 = arith.mulf %74, %78 : vector<8x8xf32>
    %80 = vector.extract_strided_slice %58 {offsets = [0, 0], sizes = [8, 16], strides = [1, 1]} : vector<16x32xf32> to vector<8x16xf32>
    %cst_35 = arith.constant dense<0.000000e+00> : vector<8x16xf32>
    %81 = tpu.matmul %79, %80, %cst_35 {dimension_numbers = #tpu.dot_dimension_numbers<[1], [0], [0], [1], [0, 0, 1, 1], [], []>} : vector<8x8xf32>, vector<8x16xf32>, vector<8x16xf32> -> vector<8x16xf32>
    %82 = vector.extract_strided_slice %60 {offsets = [0, 0], sizes = [16, 32], strides = [1, 1]} : vector<32x32xf32> to vector<16x32xf32>
    %cst_36 = arith.constant dense<0.000000e+00> : vector<8x32xf32>
    %83 = tpu.matmul %81, %82, %cst_36 {dimension_numbers = #tpu.dot_dimension_numbers<[1], [0], [0], [1], [0, 0, 1, 1], [], []>} : vector<8x16xf32>, vector<16x32xf32>, vector<8x32xf32> -> vector<8x32xf32>
    %84 = arith.addf %61, %83 : vector<8x32xf32>
    %85 = vector.extract_strided_slice %56 {offsets = [0, 16], sizes = [8, 16], strides = [1, 1]} : vector<16x32xf32> to vector<8x16xf32>
    %86 = vector.extract_strided_slice %57 {offsets = [0, 16], sizes = [8, 16], strides = [1, 1]} : vector<16x32xf32> to vector<8x16xf32>
    %87 = tpu.transpose %86, [1, 0] : vector<8x16xf32> -> vector<16x8xf32>
    %cst_37 = arith.constant dense<0.000000e+00> : vector<8x8xf32>
    %88 = tpu.matmul %85, %87, %cst_37 {dimension_numbers = #tpu.dot_dimension_numbers<[1], [0], [0], [1], [0, 0, 1, 1], [], []>} : vector<8x16xf32>, vector<16x8xf32>, vector<8x8xf32> -> vector<8x8xf32>
    %cst_38 = arith.constant 2.500000e-01 : f32
    %89 = vector.broadcast %cst_38 : f32 to vector<8x8xf32>
    %90 = arith.mulf %88, %89 : vector<8x8xf32>
    %91 = vector.broadcast %13 : vector<1x8xf32> to vector<8x8xf32>
    %92 = arith.addf %90, %91 : vector<8x8xf32>
    %cst_39 = arith.constant dense<0xFF800000> : vector<8xf32>
    %93 = vector.multi_reduction <maximumf>, %92, %cst_39 [1] : vector<8x8xf32> to vector<8xf32>
    %94 = vector.shape_cast %93 : vector<8xf32> to vector<8x1xf32>
    %95 = vector.broadcast %94 : vector<8x1xf32> to vector<8x8xf32>
    %96 = arith.subf %92, %95 : vector<8x8xf32>
    %97 = math.exp %96 : vector<8x8xf32>
    %cst_40 = arith.constant dense<0.000000e+00> : vector<8xf32>
    %98 = vector.multi_reduction <add>, %97, %cst_40 [1] : vector<8x8xf32> to vector<8xf32>
    %99 = vector.shape_cast %98 : vector<8xf32> to vector<8x1xf32>
    %100 = tpu.reciprocal %99 {approx = true} : vector<8x1xf32> -> vector<8x1xf32>
    %101 = vector.broadcast %100 : vector<8x1xf32> to vector<8x8xf32>
    %102 = arith.mulf %97, %101 : vector<8x8xf32>
    %103 = vector.extract_strided_slice %58 {offsets = [0, 16], sizes = [8, 16], strides = [1, 1]} : vector<16x32xf32> to vector<8x16xf32>
    %cst_41 = arith.constant dense<0.000000e+00> : vector<8x16xf32>
    %104 = tpu.matmul %102, %103, %cst_41 {dimension_numbers = #tpu.dot_dimension_numbers<[1], [0], [0], [1], [0, 0, 1, 1], [], []>} : vector<8x8xf32>, vector<8x16xf32>, vector<8x16xf32> -> vector<8x16xf32>
    %105 = vector.extract_strided_slice %60 {offsets = [16, 0], sizes = [16, 32], strides = [1, 1]} : vector<32x32xf32> to vector<16x32xf32>
    %cst_42 = arith.constant dense<0.000000e+00> : vector<8x32xf32>
    %106 = tpu.matmul %104, %105, %cst_42 {dimension_numbers = #tpu.dot_dimension_numbers<[1], [0], [0], [1], [0, 0, 1, 1], [], []>} : vector<8x16xf32>, vector<16x32xf32>, vector<8x32xf32> -> vector<8x32xf32>
    %107 = arith.addf %84, %106 : vector<8x32xf32>
    %cst_43 = arith.constant 0.000000e+00 : f32
    %108 = vector.broadcast %cst_43 : f32 to vector<8x32xf32>
    %109 = vector.extract_strided_slice %56 {offsets = [8, 0], sizes = [8, 16], strides = [1, 1]} : vector<16x32xf32> to vector<8x16xf32>
    %110 = vector.extract_strided_slice %57 {offsets = [8, 0], sizes = [8, 16], strides = [1, 1]} : vector<16x32xf32> to vector<8x16xf32>
    %111 = tpu.transpose %110, [1, 0] : vector<8x16xf32> -> vector<16x8xf32>
    %cst_44 = arith.constant dense<0.000000e+00> : vector<8x8xf32>
    %112 = tpu.matmul %109, %111, %cst_44 {dimension_numbers = #tpu.dot_dimension_numbers<[1], [0], [0], [1], [0, 0, 1, 1], [], []>} : vector<8x16xf32>, vector<16x8xf32>, vector<8x8xf32> -> vector<8x8xf32>
    %cst_45 = arith.constant 2.500000e-01 : f32
    %113 = vector.broadcast %cst_45 : f32 to vector<8x8xf32>
    %114 = arith.mulf %112, %113 : vector<8x8xf32>
    %115 = vector.broadcast %18 : vector<1x8xf32> to vector<8x8xf32>
    %116 = arith.addf %114, %115 : vector<8x8xf32>
    %cst_46 = arith.constant dense<0xFF800000> : vector<8xf32>
    %117 = vector.multi_reduction <maximumf>, %116, %cst_46 [1] : vector<8x8xf32> to vector<8xf32>
    %118 = vector.shape_cast %117 : vector<8xf32> to vector<8x1xf32>
    %119 = vector.broadcast %118 : vector<8x1xf32> to vector<8x8xf32>
    %120 = arith.subf %116, %119 : vector<8x8xf32>
    %121 = math.exp %120 : vector<8x8xf32>
    %cst_47 = arith.constant dense<0.000000e+00> : vector<8xf32>
    %122 = vector.multi_reduction <add>, %121, %cst_47 [1] : vector<8x8xf32> to vector<8xf32>
    %123 = vector.shape_cast %122 : vector<8xf32> to vector<8x1xf32>
    %124 = tpu.reciprocal %123 {approx = true} : vector<8x1xf32> -> vector<8x1xf32>
    %125 = vector.broadcast %124 : vector<8x1xf32> to vector<8x8xf32>
    %126 = arith.mulf %121, %125 : vector<8x8xf32>
    %127 = vector.extract_strided_slice %58 {offsets = [8, 0], sizes = [8, 16], strides = [1, 1]} : vector<16x32xf32> to vector<8x16xf32>
    %cst_48 = arith.constant dense<0.000000e+00> : vector<8x16xf32>
    %128 = tpu.matmul %126, %127, %cst_48 {dimension_numbers = #tpu.dot_dimension_numbers<[1], [0], [0], [1], [0, 0, 1, 1], [], []>} : vector<8x8xf32>, vector<8x16xf32>, vector<8x16xf32> -> vector<8x16xf32>
    %129 = vector.extract_strided_slice %60 {offsets = [0, 0], sizes = [16, 32], strides = [1, 1]} : vector<32x32xf32> to vector<16x32xf32>
    %cst_49 = arith.constant dense<0.000000e+00> : vector<8x32xf32>
    %130 = tpu.matmul %128, %129, %cst_49 {dimension_numbers = #tpu.dot_dimension_numbers<[1], [0], [0], [1], [0, 0, 1, 1], [], []>} : vector<8x16xf32>, vector<16x32xf32>, vector<8x32xf32> -> vector<8x32xf32>
    %131 = arith.addf %108, %130 : vector<8x32xf32>
    %132 = vector.extract_strided_slice %56 {offsets = [8, 16], sizes = [8, 16], strides = [1, 1]} : vector<16x32xf32> to vector<8x16xf32>
    %133 = vector.extract_strided_slice %57 {offsets = [8, 16], sizes = [8, 16], strides = [1, 1]} : vector<16x32xf32> to vector<8x16xf32>
    %134 = tpu.transpose %133, [1, 0] : vector<8x16xf32> -> vector<16x8xf32>
    %cst_50 = arith.constant dense<0.000000e+00> : vector<8x8xf32>
    %135 = tpu.matmul %132, %134, %cst_50 {dimension_numbers = #tpu.dot_dimension_numbers<[1], [0], [0], [1], [0, 0, 1, 1], [], []>} : vector<8x16xf32>, vector<16x8xf32>, vector<8x8xf32> -> vector<8x8xf32>
    %cst_51 = arith.constant 2.500000e-01 : f32
    %136 = vector.broadcast %cst_51 : f32 to vector<8x8xf32>
    %137 = arith.mulf %135, %136 : vector<8x8xf32>
    %138 = vector.broadcast %18 : vector<1x8xf32> to vector<8x8xf32>
    %139 = arith.addf %137, %138 : vector<8x8xf32>
    %cst_52 = arith.constant dense<0xFF800000> : vector<8xf32>
    %140 = vector.multi_reduction <maximumf>, %139, %cst_52 [1] : vector<8x8xf32> to vector<8xf32>
    %141 = vector.shape_cast %140 : vector<8xf32> to vector<8x1xf32>
    %142 = vector.broadcast %141 : vector<8x1xf32> to vector<8x8xf32>
    %143 = arith.subf %139, %142 : vector<8x8xf32>
    %144 = math.exp %143 : vector<8x8xf32>
    %cst_53 = arith.constant dense<0.000000e+00> : vector<8xf32>
    %145 = vector.multi_reduction <add>, %144, %cst_53 [1] : vector<8x8xf32> to vector<8xf32>
    %146 = vector.shape_cast %145 : vector<8xf32> to vector<8x1xf32>
    %147 = tpu.reciprocal %146 {approx = true} : vector<8x1xf32> -> vector<8x1xf32>
    %148 = vector.broadcast %147 : vector<8x1xf32> to vector<8x8xf32>
    %149 = arith.mulf %144, %148 : vector<8x8xf32>
    %150 = vector.extract_strided_slice %58 {offsets = [8, 16], sizes = [8, 16], strides = [1, 1]} : vector<16x32xf32> to vector<8x16xf32>
    %cst_54 = arith.constant dense<0.000000e+00> : vector<8x16xf32>
    %151 = tpu.matmul %149, %150, %cst_54 {dimension_numbers = #tpu.dot_dimension_numbers<[1], [0], [0], [1], [0, 0, 1, 1], [], []>} : vector<8x8xf32>, vector<8x16xf32>, vector<8x16xf32> -> vector<8x16xf32>
    %152 = vector.extract_strided_slice %60 {offsets = [16, 0], sizes = [16, 32], strides = [1, 1]} : vector<32x32xf32> to vector<16x32xf32>
    %cst_55 = arith.constant dense<0.000000e+00> : vector<8x32xf32>
    %153 = tpu.matmul %151, %152, %cst_55 {dimension_numbers = #tpu.dot_dimension_numbers<[1], [0], [0], [1], [0, 0, 1, 1], [], []>} : vector<8x16xf32>, vector<16x32xf32>, vector<8x32xf32> -> vector<8x32xf32>
    %154 = arith.addf %131, %153 : vector<8x32xf32>
    %155 = tpu.concatenate %107, %154 in 0 : vector<8x32xf32>, vector<8x32xf32> -> vector<16x32xf32>
    %c0_56 = arith.constant 0 : index
    %c0_57 = arith.constant 0 : index
    %c0_58 = arith.constant 0 : index
    %156 = vector.load %arg8[%c0_56, %c0_57, %c0_58] : memref<2x1x32xf32, #tpu.memory_space<vmem>>, vector<1x1x32xf32>
    %157 = vector.shape_cast %156 : vector<1x1x32xf32> to vector<1x32xf32>
    %158 = vector.broadcast %157 : vector<1x32xf32> to vector<16x32xf32>
    %159 = arith.addf %155, %158 : vector<16x32xf32>
    %160 = arith.addf %22, %159 : vector<16x32xf32>
    %161 = vector.broadcast %8 : vector<16x1xf32> to vector<16x32xf32>
    %162 = arith.mulf %160, %161 : vector<16x32xf32>
    %c0_59 = arith.constant 0 : index
    %c0_60 = arith.constant 0 : index
    %c0_61 = arith.constant 0 : index
    %163 = vector.load %arg9[%c0_59, %c0_60, %c0_61] : memref<2x1x32xf32, #tpu.memory_space<vmem>>, vector<1x1x32xf32>
    %164 = vector.shape_cast %163 : vector<1x1x32xf32> to vector<1x32xf32>
    %c0_62 = arith.constant 0 : index
    %c0_63 = arith.constant 0 : index
    %c0_64 = arith.constant 0 : index
    %165 = vector.load %arg10[%c0_62, %c0_63, %c0_64] : memref<2x1x32xf32, #tpu.memory_space<vmem>>, vector<1x1x32xf32>
    %166 = vector.shape_cast %165 : vector<1x1x32xf32> to vector<1x32xf32>
    %cst_65 = arith.constant dense<0.000000e+00> : vector<16xf32>
    %167 = vector.multi_reduction <add>, %162, %cst_65 [1] : vector<16x32xf32> to vector<16xf32>
    %168 = vector.shape_cast %167 : vector<16xf32> to vector<16x1xf32>
    %cst_66 = arith.constant 3.200000e+01 : f32
    %169 = vector.broadcast %cst_66 : f32 to vector<16x1xf32>
    %170 = arith.divf %168, %169 : vector<16x1xf32>
    %171 = vector.broadcast %170 : vector<16x1xf32> to vector<16x32xf32>
    %172 = arith.subf %162, %171 : vector<16x32xf32>
    %173 = arith.mulf %172, %172 : vector<16x32xf32>
    %cst_67 = arith.constant dense<0.000000e+00> : vector<16xf32>
    %174 = vector.multi_reduction <add>, %173, %cst_67 [1] : vector<16x32xf32> to vector<16xf32>
    %175 = vector.shape_cast %174 : vector<16xf32> to vector<16x1xf32>
    %cst_68 = arith.constant 3.200000e+01 : f32
    %176 = vector.broadcast %cst_68 : f32 to vector<16x1xf32>
    %177 = arith.divf %175, %176 : vector<16x1xf32>
    %178 = vector.broadcast %170 : vector<16x1xf32> to vector<16x32xf32>
    %179 = arith.subf %162, %178 : vector<16x32xf32>
    %cst_69 = arith.constant 9.99999974E-6 : f32
    %180 = vector.broadcast %cst_69 : f32 to vector<16x1xf32>
    %181 = arith.addf %177, %180 : vector<16x1xf32>
    %182 = math.rsqrt %181 : vector<16x1xf32>
    %183 = vector.broadcast %182 : vector<16x1xf32> to vector<16x32xf32>
    %184 = arith.mulf %179, %183 : vector<16x32xf32>
    %185 = vector.broadcast %164 : vector<1x32xf32> to vector<16x32xf32>
    %186 = arith.mulf %184, %185 : vector<16x32xf32>
    %187 = vector.broadcast %166 : vector<1x32xf32> to vector<16x32xf32>
    %188 = arith.addf %186, %187 : vector<16x32xf32>
    %c0_70 = arith.constant 0 : index
    %c0_71 = arith.constant 0 : index
    %c0_72 = arith.constant 0 : index
    %189 = vector.load %arg11[%c0_70, %c0_71, %c0_72] : memref<2x32x64xf32, #tpu.memory_space<vmem>>, vector<1x32x64xf32>
    %190 = vector.shape_cast %189 : vector<1x32x64xf32> to vector<32x64xf32>
    %cst_73 = arith.constant dense<0.000000e+00> : vector<16x64xf32>
    %191 = tpu.matmul %188, %190, %cst_73 {dimension_numbers = #tpu.dot_dimension_numbers<[1], [0], [0], [1], [0, 0, 1, 1], [], []>} : vector<16x32xf32>, vector<32x64xf32>, vector<16x64xf32> -> vector<16x64xf32>
    %c0_74 = arith.constant 0 : index
    %c0_75 = arith.constant 0 : index
    %c0_76 = arith.constant 0 : index
    %192 = vector.load %arg12[%c0_74, %c0_75, %c0_76] : memref<2x1x64xf32, #tpu.memory_space<vmem>>, vector<1x1x64xf32>
    %193 = vector.shape_cast %192 : vector<1x1x64xf32> to vector<1x64xf32>
    %194 = vector.broadcast %193 : vector<1x64xf32> to vector<16x64xf32>
    %195 = arith.addf %191, %194 : vector<16x64xf32>
    %cst_77 = arith.constant 0.000000e+00 : f32
    %196 = vector.broadcast %cst_77 : f32 to vector<16x64xf32>
    %197 = arith.maximumf %195, %196 : vector<16x64xf32>
    %c0_78 = arith.constant 0 : index
    %c0_79 = arith.constant 0 : index
    %c0_80 = arith.constant 0 : index
    %198 = vector.load %arg13[%c0_78, %c0_79, %c0_80] : memref<2x64x32xf32, #tpu.memory_space<vmem>>, vector<1x64x32xf32>
    %199 = vector.shape_cast %198 : vector<1x64x32xf32> to vector<64x32xf32>
    %cst_81 = arith.constant dense<0.000000e+00> : vector<16x32xf32>
    %200 = tpu.matmul %197, %199, %cst_81 {dimension_numbers = #tpu.dot_dimension_numbers<[1], [0], [0], [1], [0, 0, 1, 1], [], []>} : vector<16x64xf32>, vector<64x32xf32>, vector<16x32xf32> -> vector<16x32xf32>
    %c0_82 = arith.constant 0 : index
    %c0_83 = arith.constant 0 : index
    %c0_84 = arith.constant 0 : index
    %201 = vector.load %arg14[%c0_82, %c0_83, %c0_84] : memref<2x1x32xf32, #tpu.memory_space<vmem>>, vector<1x1x32xf32>
    %202 = vector.shape_cast %201 : vector<1x1x32xf32> to vector<1x32xf32>
    %203 = vector.broadcast %202 : vector<1x32xf32> to vector<16x32xf32>
    %204 = arith.addf %200, %203 : vector<16x32xf32>
    %205 = arith.addf %162, %204 : vector<16x32xf32>
    %206 = vector.broadcast %8 : vector<16x1xf32> to vector<16x32xf32>
    %207 = arith.mulf %205, %206 : vector<16x32xf32>
    %c1 = arith.constant 1 : index
    %c0_85 = arith.constant 0 : index
    %c0_86 = arith.constant 0 : index
    %208 = vector.load %arg3[%c1, %c0_85, %c0_86] : memref<2x1x32xf32, #tpu.memory_space<vmem>>, vector<1x1x32xf32>
    %209 = vector.shape_cast %208 : vector<1x1x32xf32> to vector<1x32xf32>
    %c1_87 = arith.constant 1 : index
    %c0_88 = arith.constant 0 : index
    %c0_89 = arith.constant 0 : index
    %210 = vector.load %arg4[%c1_87, %c0_88, %c0_89] : memref<2x1x32xf32, #tpu.memory_space<vmem>>, vector<1x1x32xf32>
    %211 = vector.shape_cast %210 : vector<1x1x32xf32> to vector<1x32xf32>
    %cst_90 = arith.constant dense<0.000000e+00> : vector<16xf32>
    %212 = vector.multi_reduction <add>, %207, %cst_90 [1] : vector<16x32xf32> to vector<16xf32>
    %213 = vector.shape_cast %212 : vector<16xf32> to vector<16x1xf32>
    %cst_91 = arith.constant 3.200000e+01 : f32
    %214 = vector.broadcast %cst_91 : f32 to vector<16x1xf32>
    %215 = arith.divf %213, %214 : vector<16x1xf32>
    %216 = vector.broadcast %215 : vector<16x1xf32> to vector<16x32xf32>
    %217 = arith.subf %207, %216 : vector<16x32xf32>
    %218 = arith.mulf %217, %217 : vector<16x32xf32>
    %cst_92 = arith.constant dense<0.000000e+00> : vector<16xf32>
    %219 = vector.multi_reduction <add>, %218, %cst_92 [1] : vector<16x32xf32> to vector<16xf32>
    %220 = vector.shape_cast %219 : vector<16xf32> to vector<16x1xf32>
    %cst_93 = arith.constant 3.200000e+01 : f32
    %221 = vector.broadcast %cst_93 : f32 to vector<16x1xf32>
    %222 = arith.divf %220, %221 : vector<16x1xf32>
    %223 = vector.broadcast %215 : vector<16x1xf32> to vector<16x32xf32>
    %224 = arith.subf %207, %223 : vector<16x32xf32>
    %cst_94 = arith.constant 9.99999974E-6 : f32
    %225 = vector.broadcast %cst_94 : f32 to vector<16x1xf32>
    %226 = arith.addf %222, %225 : vector<16x1xf32>
    %227 = math.rsqrt %226 : vector<16x1xf32>
    %228 = vector.broadcast %227 : vector<16x1xf32> to vector<16x32xf32>
    %229 = arith.mulf %224, %228 : vector<16x32xf32>
    %230 = vector.broadcast %209 : vector<1x32xf32> to vector<16x32xf32>
    %231 = arith.mulf %229, %230 : vector<16x32xf32>
    %232 = vector.broadcast %211 : vector<1x32xf32> to vector<16x32xf32>
    %233 = arith.addf %231, %232 : vector<16x32xf32>
    %c1_95 = arith.constant 1 : index
    %c0_96 = arith.constant 0 : index
    %c0_97 = arith.constant 0 : index
    %234 = vector.load %arg5[%c1_95, %c0_96, %c0_97] : memref<2x32x96xf32, #tpu.memory_space<vmem>>, vector<1x32x96xf32>
    %235 = vector.shape_cast %234 : vector<1x32x96xf32> to vector<32x96xf32>
    %cst_98 = arith.constant dense<0.000000e+00> : vector<16x96xf32>
    %236 = tpu.matmul %233, %235, %cst_98 {dimension_numbers = #tpu.dot_dimension_numbers<[1], [0], [0], [1], [0, 0, 1, 1], [], []>} : vector<16x32xf32>, vector<32x96xf32>, vector<16x96xf32> -> vector<16x96xf32>
    %c1_99 = arith.constant 1 : index
    %c0_100 = arith.constant 0 : index
    %c0_101 = arith.constant 0 : index
    %237 = vector.load %arg6[%c1_99, %c0_100, %c0_101] : memref<2x1x96xf32, #tpu.memory_space<vmem>>, vector<1x1x96xf32>
    %238 = vector.shape_cast %237 : vector<1x1x96xf32> to vector<1x96xf32>
    %239 = vector.broadcast %238 : vector<1x96xf32> to vector<16x96xf32>
    %240 = arith.addf %236, %239 : vector<16x96xf32>
    %241 = vector.extract_strided_slice %240 {offsets = [0, 0], sizes = [16, 32], strides = [1, 1]} : vector<16x96xf32> to vector<16x32xf32>
    %242 = vector.extract_strided_slice %240 {offsets = [0, 32], sizes = [16, 32], strides = [1, 1]} : vector<16x96xf32> to vector<16x32xf32>
    %243 = vector.extract_strided_slice %240 {offsets = [0, 64], sizes = [16, 32], strides = [1, 1]} : vector<16x96xf32> to vector<16x32xf32>
    %c1_102 = arith.constant 1 : index
    %c0_103 = arith.constant 0 : index
    %c0_104 = arith.constant 0 : index
    %244 = vector.load %arg7[%c1_102, %c0_103, %c0_104] : memref<2x32x32xf32, #tpu.memory_space<vmem>>, vector<1x32x32xf32>
    %245 = vector.shape_cast %244 : vector<1x32x32xf32> to vector<32x32xf32>
    %cst_105 = arith.constant 0.000000e+00 : f32
    %246 = vector.broadcast %cst_105 : f32 to vector<8x32xf32>
    %247 = vector.extract_strided_slice %241 {offsets = [0, 0], sizes = [8, 16], strides = [1, 1]} : vector<16x32xf32> to vector<8x16xf32>
    %248 = vector.extract_strided_slice %242 {offsets = [0, 0], sizes = [8, 16], strides = [1, 1]} : vector<16x32xf32> to vector<8x16xf32>
    %249 = tpu.transpose %248, [1, 0] : vector<8x16xf32> -> vector<16x8xf32>
    %cst_106 = arith.constant dense<0.000000e+00> : vector<8x8xf32>
    %250 = tpu.matmul %247, %249, %cst_106 {dimension_numbers = #tpu.dot_dimension_numbers<[1], [0], [0], [1], [0, 0, 1, 1], [], []>} : vector<8x16xf32>, vector<16x8xf32>, vector<8x8xf32> -> vector<8x8xf32>
    %cst_107 = arith.constant 2.500000e-01 : f32
    %251 = vector.broadcast %cst_107 : f32 to vector<8x8xf32>
    %252 = arith.mulf %250, %251 : vector<8x8xf32>
    %253 = vector.broadcast %13 : vector<1x8xf32> to vector<8x8xf32>
    %254 = arith.addf %252, %253 : vector<8x8xf32>
    %cst_108 = arith.constant dense<0xFF800000> : vector<8xf32>
    %255 = vector.multi_reduction <maximumf>, %254, %cst_108 [1] : vector<8x8xf32> to vector<8xf32>
    %256 = vector.shape_cast %255 : vector<8xf32> to vector<8x1xf32>
    %257 = vector.broadcast %256 : vector<8x1xf32> to vector<8x8xf32>
    %258 = arith.subf %254, %257 : vector<8x8xf32>
    %259 = math.exp %258 : vector<8x8xf32>
    %cst_109 = arith.constant dense<0.000000e+00> : vector<8xf32>
    %260 = vector.multi_reduction <add>, %259, %cst_109 [1] : vector<8x8xf32> to vector<8xf32>
    %261 = vector.shape_cast %260 : vector<8xf32> to vector<8x1xf32>
    %262 = tpu.reciprocal %261 {approx = true} : vector<8x1xf32> -> vector<8x1xf32>
    %263 = vector.broadcast %262 : vector<8x1xf32> to vector<8x8xf32>
    %264 = arith.mulf %259, %263 : vector<8x8xf32>
    %265 = vector.extract_strided_slice %243 {offsets = [0, 0], sizes = [8, 16], strides = [1, 1]} : vector<16x32xf32> to vector<8x16xf32>
    %cst_110 = arith.constant dense<0.000000e+00> : vector<8x16xf32>
    %266 = tpu.matmul %264, %265, %cst_110 {dimension_numbers = #tpu.dot_dimension_numbers<[1], [0], [0], [1], [0, 0, 1, 1], [], []>} : vector<8x8xf32>, vector<8x16xf32>, vector<8x16xf32> -> vector<8x16xf32>
    %267 = vector.extract_strided_slice %245 {offsets = [0, 0], sizes = [16, 32], strides = [1, 1]} : vector<32x32xf32> to vector<16x32xf32>
    %cst_111 = arith.constant dense<0.000000e+00> : vector<8x32xf32>
    %268 = tpu.matmul %266, %267, %cst_111 {dimension_numbers = #tpu.dot_dimension_numbers<[1], [0], [0], [1], [0, 0, 1, 1], [], []>} : vector<8x16xf32>, vector<16x32xf32>, vector<8x32xf32> -> vector<8x32xf32>
    %269 = arith.addf %246, %268 : vector<8x32xf32>
    %270 = vector.extract_strided_slice %241 {offsets = [0, 16], sizes = [8, 16], strides = [1, 1]} : vector<16x32xf32> to vector<8x16xf32>
    %271 = vector.extract_strided_slice %242 {offsets = [0, 16], sizes = [8, 16], strides = [1, 1]} : vector<16x32xf32> to vector<8x16xf32>
    %272 = tpu.transpose %271, [1, 0] : vector<8x16xf32> -> vector<16x8xf32>
    %cst_112 = arith.constant dense<0.000000e+00> : vector<8x8xf32>
    %273 = tpu.matmul %270, %272, %cst_112 {dimension_numbers = #tpu.dot_dimension_numbers<[1], [0], [0], [1], [0, 0, 1, 1], [], []>} : vector<8x16xf32>, vector<16x8xf32>, vector<8x8xf32> -> vector<8x8xf32>
    %cst_113 = arith.constant 2.500000e-01 : f32
    %274 = vector.broadcast %cst_113 : f32 to vector<8x8xf32>
    %275 = arith.mulf %273, %274 : vector<8x8xf32>
    %276 = vector.broadcast %13 : vector<1x8xf32> to vector<8x8xf32>
    %277 = arith.addf %275, %276 : vector<8x8xf32>
    %cst_114 = arith.constant dense<0xFF800000> : vector<8xf32>
    %278 = vector.multi_reduction <maximumf>, %277, %cst_114 [1] : vector<8x8xf32> to vector<8xf32>
    %279 = vector.shape_cast %278 : vector<8xf32> to vector<8x1xf32>
    %280 = vector.broadcast %279 : vector<8x1xf32> to vector<8x8xf32>
    %281 = arith.subf %277, %280 : vector<8x8xf32>
    %282 = math.exp %281 : vector<8x8xf32>
    %cst_115 = arith.constant dense<0.000000e+00> : vector<8xf32>
    %283 = vector.multi_reduction <add>, %282, %cst_115 [1] : vector<8x8xf32> to vector<8xf32>
    %284 = vector.shape_cast %283 : vector<8xf32> to vector<8x1xf32>
    %285 = tpu.reciprocal %284 {approx = true} : vector<8x1xf32> -> vector<8x1xf32>
    %286 = vector.broadcast %285 : vector<8x1xf32> to vector<8x8xf32>
    %287 = arith.mulf %282, %286 : vector<8x8xf32>
    %288 = vector.extract_strided_slice %243 {offsets = [0, 16], sizes = [8, 16], strides = [1, 1]} : vector<16x32xf32> to vector<8x16xf32>
    %cst_116 = arith.constant dense<0.000000e+00> : vector<8x16xf32>
    %289 = tpu.matmul %287, %288, %cst_116 {dimension_numbers = #tpu.dot_dimension_numbers<[1], [0], [0], [1], [0, 0, 1, 1], [], []>} : vector<8x8xf32>, vector<8x16xf32>, vector<8x16xf32> -> vector<8x16xf32>
    %290 = vector.extract_strided_slice %245 {offsets = [16, 0], sizes = [16, 32], strides = [1, 1]} : vector<32x32xf32> to vector<16x32xf32>
    %cst_117 = arith.constant dense<0.000000e+00> : vector<8x32xf32>
    %291 = tpu.matmul %289, %290, %cst_117 {dimension_numbers = #tpu.dot_dimension_numbers<[1], [0], [0], [1], [0, 0, 1, 1], [], []>} : vector<8x16xf32>, vector<16x32xf32>, vector<8x32xf32> -> vector<8x32xf32>
    %292 = arith.addf %269, %291 : vector<8x32xf32>
    %cst_118 = arith.constant 0.000000e+00 : f32
    %293 = vector.broadcast %cst_118 : f32 to vector<8x32xf32>
    %294 = vector.extract_strided_slice %241 {offsets = [8, 0], sizes = [8, 16], strides = [1, 1]} : vector<16x32xf32> to vector<8x16xf32>
    %295 = vector.extract_strided_slice %242 {offsets = [8, 0], sizes = [8, 16], strides = [1, 1]} : vector<16x32xf32> to vector<8x16xf32>
    %296 = tpu.transpose %295, [1, 0] : vector<8x16xf32> -> vector<16x8xf32>
    %cst_119 = arith.constant dense<0.000000e+00> : vector<8x8xf32>
    %297 = tpu.matmul %294, %296, %cst_119 {dimension_numbers = #tpu.dot_dimension_numbers<[1], [0], [0], [1], [0, 0, 1, 1], [], []>} : vector<8x16xf32>, vector<16x8xf32>, vector<8x8xf32> -> vector<8x8xf32>
    %cst_120 = arith.constant 2.500000e-01 : f32
    %298 = vector.broadcast %cst_120 : f32 to vector<8x8xf32>
    %299 = arith.mulf %297, %298 : vector<8x8xf32>
    %300 = vector.broadcast %18 : vector<1x8xf32> to vector<8x8xf32>
    %301 = arith.addf %299, %300 : vector<8x8xf32>
    %cst_121 = arith.constant dense<0xFF800000> : vector<8xf32>
    %302 = vector.multi_reduction <maximumf>, %301, %cst_121 [1] : vector<8x8xf32> to vector<8xf32>
    %303 = vector.shape_cast %302 : vector<8xf32> to vector<8x1xf32>
    %304 = vector.broadcast %303 : vector<8x1xf32> to vector<8x8xf32>
    %305 = arith.subf %301, %304 : vector<8x8xf32>
    %306 = math.exp %305 : vector<8x8xf32>
    %cst_122 = arith.constant dense<0.000000e+00> : vector<8xf32>
    %307 = vector.multi_reduction <add>, %306, %cst_122 [1] : vector<8x8xf32> to vector<8xf32>
    %308 = vector.shape_cast %307 : vector<8xf32> to vector<8x1xf32>
    %309 = tpu.reciprocal %308 {approx = true} : vector<8x1xf32> -> vector<8x1xf32>
    %310 = vector.broadcast %309 : vector<8x1xf32> to vector<8x8xf32>
    %311 = arith.mulf %306, %310 : vector<8x8xf32>
    %312 = vector.extract_strided_slice %243 {offsets = [8, 0], sizes = [8, 16], strides = [1, 1]} : vector<16x32xf32> to vector<8x16xf32>
    %cst_123 = arith.constant dense<0.000000e+00> : vector<8x16xf32>
    %313 = tpu.matmul %311, %312, %cst_123 {dimension_numbers = #tpu.dot_dimension_numbers<[1], [0], [0], [1], [0, 0, 1, 1], [], []>} : vector<8x8xf32>, vector<8x16xf32>, vector<8x16xf32> -> vector<8x16xf32>
    %314 = vector.extract_strided_slice %245 {offsets = [0, 0], sizes = [16, 32], strides = [1, 1]} : vector<32x32xf32> to vector<16x32xf32>
    %cst_124 = arith.constant dense<0.000000e+00> : vector<8x32xf32>
    %315 = tpu.matmul %313, %314, %cst_124 {dimension_numbers = #tpu.dot_dimension_numbers<[1], [0], [0], [1], [0, 0, 1, 1], [], []>} : vector<8x16xf32>, vector<16x32xf32>, vector<8x32xf32> -> vector<8x32xf32>
    %316 = arith.addf %293, %315 : vector<8x32xf32>
    %317 = vector.extract_strided_slice %241 {offsets = [8, 16], sizes = [8, 16], strides = [1, 1]} : vector<16x32xf32> to vector<8x16xf32>
    %318 = vector.extract_strided_slice %242 {offsets = [8, 16], sizes = [8, 16], strides = [1, 1]} : vector<16x32xf32> to vector<8x16xf32>
    %319 = tpu.transpose %318, [1, 0] : vector<8x16xf32> -> vector<16x8xf32>
    %cst_125 = arith.constant dense<0.000000e+00> : vector<8x8xf32>
    %320 = tpu.matmul %317, %319, %cst_125 {dimension_numbers = #tpu.dot_dimension_numbers<[1], [0], [0], [1], [0, 0, 1, 1], [], []>} : vector<8x16xf32>, vector<16x8xf32>, vector<8x8xf32> -> vector<8x8xf32>
    %cst_126 = arith.constant 2.500000e-01 : f32
    %321 = vector.broadcast %cst_126 : f32 to vector<8x8xf32>
    %322 = arith.mulf %320, %321 : vector<8x8xf32>
    %323 = vector.broadcast %18 : vector<1x8xf32> to vector<8x8xf32>
    %324 = arith.addf %322, %323 : vector<8x8xf32>
    %cst_127 = arith.constant dense<0xFF800000> : vector<8xf32>
    %325 = vector.multi_reduction <maximumf>, %324, %cst_127 [1] : vector<8x8xf32> to vector<8xf32>
    %326 = vector.shape_cast %325 : vector<8xf32> to vector<8x1xf32>
    %327 = vector.broadcast %326 : vector<8x1xf32> to vector<8x8xf32>
    %328 = arith.subf %324, %327 : vector<8x8xf32>
    %329 = math.exp %328 : vector<8x8xf32>
    %cst_128 = arith.constant dense<0.000000e+00> : vector<8xf32>
    %330 = vector.multi_reduction <add>, %329, %cst_128 [1] : vector<8x8xf32> to vector<8xf32>
    %331 = vector.shape_cast %330 : vector<8xf32> to vector<8x1xf32>
    %332 = tpu.reciprocal %331 {approx = true} : vector<8x1xf32> -> vector<8x1xf32>
    %333 = vector.broadcast %332 : vector<8x1xf32> to vector<8x8xf32>
    %334 = arith.mulf %329, %333 : vector<8x8xf32>
    %335 = vector.extract_strided_slice %243 {offsets = [8, 16], sizes = [8, 16], strides = [1, 1]} : vector<16x32xf32> to vector<8x16xf32>
    %cst_129 = arith.constant dense<0.000000e+00> : vector<8x16xf32>
    %336 = tpu.matmul %334, %335, %cst_129 {dimension_numbers = #tpu.dot_dimension_numbers<[1], [0], [0], [1], [0, 0, 1, 1], [], []>} : vector<8x8xf32>, vector<8x16xf32>, vector<8x16xf32> -> vector<8x16xf32>
    %337 = vector.extract_strided_slice %245 {offsets = [16, 0], sizes = [16, 32], strides = [1, 1]} : vector<32x32xf32> to vector<16x32xf32>
    %cst_130 = arith.constant dense<0.000000e+00> : vector<8x32xf32>
    %338 = tpu.matmul %336, %337, %cst_130 {dimension_numbers = #tpu.dot_dimension_numbers<[1], [0], [0], [1], [0, 0, 1, 1], [], []>} : vector<8x16xf32>, vector<16x32xf32>, vector<8x32xf32> -> vector<8x32xf32>
    %339 = arith.addf %316, %338 : vector<8x32xf32>
    %340 = tpu.concatenate %292, %339 in 0 : vector<8x32xf32>, vector<8x32xf32> -> vector<16x32xf32>
    %c1_131 = arith.constant 1 : index
    %c0_132 = arith.constant 0 : index
    %c0_133 = arith.constant 0 : index
    %341 = vector.load %arg8[%c1_131, %c0_132, %c0_133] : memref<2x1x32xf32, #tpu.memory_space<vmem>>, vector<1x1x32xf32>
    %342 = vector.shape_cast %341 : vector<1x1x32xf32> to vector<1x32xf32>
    %343 = vector.broadcast %342 : vector<1x32xf32> to vector<16x32xf32>
    %344 = arith.addf %340, %343 : vector<16x32xf32>
    %345 = arith.addf %207, %344 : vector<16x32xf32>
    %346 = vector.broadcast %8 : vector<16x1xf32> to vector<16x32xf32>
    %347 = arith.mulf %345, %346 : vector<16x32xf32>
    %c1_134 = arith.constant 1 : index
    %c0_135 = arith.constant 0 : index
    %c0_136 = arith.constant 0 : index
    %348 = vector.load %arg9[%c1_134, %c0_135, %c0_136] : memref<2x1x32xf32, #tpu.memory_space<vmem>>, vector<1x1x32xf32>
    %349 = vector.shape_cast %348 : vector<1x1x32xf32> to vector<1x32xf32>
    %c1_137 = arith.constant 1 : index
    %c0_138 = arith.constant 0 : index
    %c0_139 = arith.constant 0 : index
    %350 = vector.load %arg10[%c1_137, %c0_138, %c0_139] : memref<2x1x32xf32, #tpu.memory_space<vmem>>, vector<1x1x32xf32>
    %351 = vector.shape_cast %350 : vector<1x1x32xf32> to vector<1x32xf32>
    %cst_140 = arith.constant dense<0.000000e+00> : vector<16xf32>
    %352 = vector.multi_reduction <add>, %347, %cst_140 [1] : vector<16x32xf32> to vector<16xf32>
    %353 = vector.shape_cast %352 : vector<16xf32> to vector<16x1xf32>
    %cst_141 = arith.constant 3.200000e+01 : f32
    %354 = vector.broadcast %cst_141 : f32 to vector<16x1xf32>
    %355 = arith.divf %353, %354 : vector<16x1xf32>
    %356 = vector.broadcast %355 : vector<16x1xf32> to vector<16x32xf32>
    %357 = arith.subf %347, %356 : vector<16x32xf32>
    %358 = arith.mulf %357, %357 : vector<16x32xf32>
    %cst_142 = arith.constant dense<0.000000e+00> : vector<16xf32>
    %359 = vector.multi_reduction <add>, %358, %cst_142 [1] : vector<16x32xf32> to vector<16xf32>
    %360 = vector.shape_cast %359 : vector<16xf32> to vector<16x1xf32>
    %cst_143 = arith.constant 3.200000e+01 : f32
    %361 = vector.broadcast %cst_143 : f32 to vector<16x1xf32>
    %362 = arith.divf %360, %361 : vector<16x1xf32>
    %363 = vector.broadcast %355 : vector<16x1xf32> to vector<16x32xf32>
    %364 = arith.subf %347, %363 : vector<16x32xf32>
    %cst_144 = arith.constant 9.99999974E-6 : f32
    %365 = vector.broadcast %cst_144 : f32 to vector<16x1xf32>
    %366 = arith.addf %362, %365 : vector<16x1xf32>
    %367 = math.rsqrt %366 : vector<16x1xf32>
    %368 = vector.broadcast %367 : vector<16x1xf32> to vector<16x32xf32>
    %369 = arith.mulf %364, %368 : vector<16x32xf32>
    %370 = vector.broadcast %349 : vector<1x32xf32> to vector<16x32xf32>
    %371 = arith.mulf %369, %370 : vector<16x32xf32>
    %372 = vector.broadcast %351 : vector<1x32xf32> to vector<16x32xf32>
    %373 = arith.addf %371, %372 : vector<16x32xf32>
    %c1_145 = arith.constant 1 : index
    %c0_146 = arith.constant 0 : index
    %c0_147 = arith.constant 0 : index
    %374 = vector.load %arg11[%c1_145, %c0_146, %c0_147] : memref<2x32x64xf32, #tpu.memory_space<vmem>>, vector<1x32x64xf32>
    %375 = vector.shape_cast %374 : vector<1x32x64xf32> to vector<32x64xf32>
    %cst_148 = arith.constant dense<0.000000e+00> : vector<16x64xf32>
    %376 = tpu.matmul %373, %375, %cst_148 {dimension_numbers = #tpu.dot_dimension_numbers<[1], [0], [0], [1], [0, 0, 1, 1], [], []>} : vector<16x32xf32>, vector<32x64xf32>, vector<16x64xf32> -> vector<16x64xf32>
    %c1_149 = arith.constant 1 : index
    %c0_150 = arith.constant 0 : index
    %c0_151 = arith.constant 0 : index
    %377 = vector.load %arg12[%c1_149, %c0_150, %c0_151] : memref<2x1x64xf32, #tpu.memory_space<vmem>>, vector<1x1x64xf32>
    %378 = vector.shape_cast %377 : vector<1x1x64xf32> to vector<1x64xf32>
    %379 = vector.broadcast %378 : vector<1x64xf32> to vector<16x64xf32>
    %380 = arith.addf %376, %379 : vector<16x64xf32>
    %cst_152 = arith.constant 0.000000e+00 : f32
    %381 = vector.broadcast %cst_152 : f32 to vector<16x64xf32>
    %382 = arith.maximumf %380, %381 : vector<16x64xf32>
    %c1_153 = arith.constant 1 : index
    %c0_154 = arith.constant 0 : index
    %c0_155 = arith.constant 0 : index
    %383 = vector.load %arg13[%c1_153, %c0_154, %c0_155] : memref<2x64x32xf32, #tpu.memory_space<vmem>>, vector<1x64x32xf32>
    %384 = vector.shape_cast %383 : vector<1x64x32xf32> to vector<64x32xf32>
    %cst_156 = arith.constant dense<0.000000e+00> : vector<16x32xf32>
    %385 = tpu.matmul %382, %384, %cst_156 {dimension_numbers = #tpu.dot_dimension_numbers<[1], [0], [0], [1], [0, 0, 1, 1], [], []>} : vector<16x64xf32>, vector<64x32xf32>, vector<16x32xf32> -> vector<16x32xf32>
    %c1_157 = arith.constant 1 : index
    %c0_158 = arith.constant 0 : index
    %c0_159 = arith.constant 0 : index
    %386 = vector.load %arg14[%c1_157, %c0_158, %c0_159] : memref<2x1x32xf32, #tpu.memory_space<vmem>>, vector<1x1x32xf32>
    %387 = vector.shape_cast %386 : vector<1x1x32xf32> to vector<1x32xf32>
    %388 = vector.broadcast %387 : vector<1x32xf32> to vector<16x32xf32>
    %389 = arith.addf %385, %388 : vector<16x32xf32>
    %390 = arith.addf %347, %389 : vector<16x32xf32>
    %391 = vector.broadcast %8 : vector<16x1xf32> to vector<16x32xf32>
    %392 = arith.mulf %390, %391 : vector<16x32xf32>
    %c0_160 = arith.constant 0 : index
    %c0_161 = arith.constant 0 : index
    %393 = vector.load %arg15[%c0_160, %c0_161] : memref<1x32xf32, #tpu.memory_space<vmem>>, vector<1x32xf32>
    %c0_162 = arith.constant 0 : index
    %c0_163 = arith.constant 0 : index
    %394 = vector.load %arg16[%c0_162, %c0_163] : memref<1x32xf32, #tpu.memory_space<vmem>>, vector<1x32xf32>
    %cst_164 = arith.constant dense<0.000000e+00> : vector<16xf32>
    %395 = vector.multi_reduction <add>, %392, %cst_164 [1] : vector<16x32xf32> to vector<16xf32>
    %396 = vector.shape_cast %395 : vector<16xf32> to vector<16x1xf32>
    %cst_165 = arith.constant 3.200000e+01 : f32
    %397 = vector.broadcast %cst_165 : f32 to vector<16x1xf32>
    %398 = arith.divf %396, %397 : vector<16x1xf32>
    %399 = vector.broadcast %398 : vector<16x1xf32> to vector<16x32xf32>
    %400 = arith.subf %392, %399 : vector<16x32xf32>
    %401 = arith.mulf %400, %400 : vector<16x32xf32>
    %cst_166 = arith.constant dense<0.000000e+00> : vector<16xf32>
    %402 = vector.multi_reduction <add>, %401, %cst_166 [1] : vector<16x32xf32> to vector<16xf32>
    %403 = vector.shape_cast %402 : vector<16xf32> to vector<16x1xf32>
    %cst_167 = arith.constant 3.200000e+01 : f32
    %404 = vector.broadcast %cst_167 : f32 to vector<16x1xf32>
    %405 = arith.divf %403, %404 : vector<16x1xf32>
    %406 = vector.broadcast %398 : vector<16x1xf32> to vector<16x32xf32>
    %407 = arith.subf %392, %406 : vector<16x32xf32>
    %cst_168 = arith.constant 9.99999974E-6 : f32
    %408 = vector.broadcast %cst_168 : f32 to vector<16x1xf32>
    %409 = arith.addf %405, %408 : vector<16x1xf32>
    %410 = math.rsqrt %409 : vector<16x1xf32>
    %411 = vector.broadcast %410 : vector<16x1xf32> to vector<16x32xf32>
    %412 = arith.mulf %407, %411 : vector<16x32xf32>
    %413 = vector.broadcast %393 : vector<1x32xf32> to vector<16x32xf32>
    %414 = arith.mulf %412, %413 : vector<16x32xf32>
    %415 = vector.broadcast %394 : vector<1x32xf32> to vector<16x32xf32>
    %416 = arith.addf %414, %415 : vector<16x32xf32>
    %c0_169 = arith.constant 0 : index
    %c0_170 = arith.constant 0 : index
    %417 = vector.load %arg17[%c0_169, %c0_170] : memref<16x32xf32, #tpu.memory_space<vmem>>, vector<16x32xf32>
    tpu.vector_store %arg17[%c0_169, %c0_170], %416 {strides = array<i32>} : memref<16x32xf32, #tpu.memory_space<vmem>>, vector<16x32xf32>,
    return
  }
}

</mosaic_0001>

<bundles_post_ra>
// kernel: tpu_custom_call.1
= control target key start
LH: loop header
LB: loop body
LE: loop exit
PB: predicated region body
PF: predicated region fallthrough
CT: control target
= control target key end

     0   :  { %s2334_s0 = inlined_call_operand.<no memory space> [shape: f32[1], index: 0, kind: input, shape index: {}]   ;;  %s2335_s1 = inlined_call_operand.hbm [shape: f32[16,32], index: 1, kind: input, shape index: {}]   ;;  %s2336_s2 = inlined_call_operand.hbm [shape: f32[16,32], index: 2, kind: input, shape index: {}]   ;;  %s2337_s3 = inlined_call_operand.vmem [shape: f32[2,1,32], index: 3, kind: input, shape index: {}]   ;;  %s2338_s4 = inlined_call_operand.vmem [shape: f32[2,1,32], index: 4, kind: input, shape index: {}]   ;;  %s2339_s5 = inlined_call_operand.vmem [shape: f32[2,32,96], index: 5, kind: input, shape index: {}]   ;;  %s2340_s6 = inlined_call_operand.hbm [shape: f32[2,1,96], index: 6, kind: input, shape index: {}]   ;;  %s2341_s7 = inlined_call_operand.vmem [shape: f32[2,32,32], index: 7, kind: input, shape index: {}]   ;;  %s2342_s8 = inlined_call_operand.vmem [shape: f32[2,1,32], index: 8, kind: input, shape index: {}]   ;;  %s2343_s9 = inlined_call_operand.vmem [shape: f32[2,1,32], index: 9, kind: input, shape index: {}]   ;;  %s2344_s10 = inlined_call_operand.hbm [shape: f32[2,1,32], index: 10, kind: input, shape index: {}]   ;;  %s2345_s11 = inlined_call_operand.vmem [shape: f32[2,32,64], index: 11, kind: input, shape index: {}]   ;;  %s2346_s12 = inlined_call_operand.vmem [shape: f32[2,1,64], index: 12, kind: input, shape index: {}]   ;;  %s2347_s13 = inlined_call_operand.vmem [shape: f32[2,64,32], index: 13, kind: input, shape index: {}]   ;;  %s2348_s14 = inlined_call_operand.vmem [shape: f32[2,1,32], index: 14, kind: input, shape index: {}]   ;;  %s2349_s15 = inlined_call_operand.vmem [shape: f32[1,32], index: 15, kind: input, shape index: {}]   ;;  %s2350_s16 = inlined_call_operand.vmem [shape: f32[1,32], index: 16, kind: input, shape index: {}]   ;;  %s2351_s17 = inlined_call_operand.hbm [shape: f32[16,32], index: 17, kind: output, shape index: {}]  }
   0x1   :  { %2352 = sst [smem:[#allocation16_spill]] %s2334_s0 }
   0x2   :  { %2353 = sst [smem:[#allocation17_spill]] %s2335_s1 }
   0x3   :  { %23 = vsyncpa [#allocation4], 0 }
   0x4   :  { %24 = vsyncpa [#allocation7], 0 }
   0x5   :  { %25 = vsyncpa [#allocation10], 0 }
   0x6   :  { %26 = vsyncpa [#allocation5], 0  ;;  %s46_s26 = sshll.u32 %s2336_s2, 4  ;;  %s1774_s27 = smov [#allocation6]   ;;  %s47_s26 = int_to_ptr.hbm [resolvable:$true] %s46_s26 }
   0x7   :  { %s48_s28 = sshll.u32 %s1774_s27, 4  ;;  %s2354_s30 = sld [smem:[#allocation17_spill]]  ;;  %s49_s28 = int_to_ptr.vmem [resolvable:$true] %s48_s28 }
   0x8   :  { %s1775_s19 = smov 128   ;;  %s1776_s1 = smov 8  }
   0x9   :  { %54 = dma.hbm_to_vmem [thread:$0]  %s47_s26, 256, %s49_s28, [#allocation7], %s1775_s19, %s1775_s19, %s1776_s1  }
   0xa   :  { %s1777_s20 = smov [#allocation3]   ;;  %s65_s2 = sshll.u32 %s2340_s6, 4  ;;  %s66_s2 = int_to_ptr.hbm [resolvable:$true] %s65_s2 }
   0xb   :  { %s35_s21 = sshll.u32 %s1777_s20, 4  ;;  %s1778_s24 = smov [#allocation8]   ;;  %s36_s21 = int_to_ptr.vmem [resolvable:$true] %s35_s21 }
   0xc   :  { %s67_s25 = sshll.u32 %s1778_s24, 4  ;;  %s84_s26 = sshll.u32 %s2344_s10, 4  ;;  %s68_s25 = int_to_ptr.vmem [resolvable:$true] %s67_s25  ;;  %s85_s26 = int_to_ptr.hbm [resolvable:$true] %s84_s26 }
   0xd   :  { %s33_s18 = sshll.u32 %s2354_s30, 4  ;;  %s1779_s28 = smov 16   ;;  %s34_s18 = int_to_ptr.hbm [resolvable:$true] %s33_s18 }
   0xe   :  { %41 = dma.hbm_to_vmem [thread:$0]  %s34_s18, 256, %s36_s21, [#allocation4], %s1775_s19, %s1775_s19, %s1776_s1  }
   0xf   :  { %s1780_s0 = smov 1   ;;  %s1781_s30 = smov [#allocation9]  }
  0x10   :  { %73 = dma.hbm_to_vmem [thread:$0]  %s66_s2, 32, %s68_s25, [#allocation7], %s1779_s28, %s1779_s28, %s1780_s0  }
  0x11   :  { %s86_s20 = sshll.u32 %s1781_s30, 4  ;;  %s87_s20 = int_to_ptr.vmem [resolvable:$true] %s86_s20 }
  0x12   :  { %92 = dma.hbm_to_vmem [thread:$0]  %s85_s26, 32, %s87_s20, [#allocation10], %s1779_s28, %s1779_s28, %s1780_s0  }
  0x13   :  { %1766 = dma.done.wait [#allocation4], 256  }
  0x14   :  { %1767 = vsyncadd [#allocation4], 4294967040 }
  0x15   :  { %1768 = dma.done.wait [#allocation7], 288  }
  0x16   :  { %1769 = vsyncadd [#allocation7], 4294967008 }
  0x17   :  { %1770 = dma.done.wait [#allocation10], 32  }
  0x18   :  { %1771 = vsyncadd [#allocation10], 4294967264  ;;  %s2355_s21 = sld [smem:[#allocation16_spill]]  ;;  %v1902_v1 = vld [vmem:[#allocation3] sm:$0xff]  ;;  %v141_v2 = vld [vmem:[#allocation6] sm:$0xff]  ;;  %vm126_vm0 = vcmask 261120  }
  0x19   :  { %v1782_v6 = vmov 32.0   ;;  %v214_v18 = vld [vmem:[%s2339_s5 + $0x18] sm:$0xff]  ;;  %v213_v19 = vld [vmem:[%s2339_s5 + $0x10] sm:$0xff]  ;;  %v212_v20 = vld [vmem:[%s2339_s5 + $0x8] sm:$0xff]  ;;  %s1783_s20 = smov 112   ;;  %s1784_s6 = smov 96  }
  0x1a   :  { %1592 = vrcp.f32 %v1782_v6  ;;  %237 = vmatpush.msra.mxu0 %v214_v18  ;;  %v211_v21 = vld [vmem:[%s2339_s5] sm:$0xff]  ;;  %v1926_v22 = vld [vmem:[#allocation3 + $0x8] sm:$0xff]  ;;  %v142_v23 = vld [vmem:[#allocation6 + $0x8] sm:$0xff]  ;;  %s1785_s18 = smov 80   ;;  %v124_v45 = vand.u32 2147483647, %v1902_v1 }
  0x1b   :  { %v1574_v36 = vld [vmem:[%s2337_s3] ss:$0 sm:$0xff]  ;;  %vm255_vm5 = vcmask 130048   ;;  %vm299_vm10 = vcmask 64512   ;;  %s1788_s10 = smov 48  }
  0x1c   :  { %238 = vmatpush.msra.mxu0 %v213_v19  ;;  %v1575_v39 = vld [vmem:[%s2338_s4] ss:$0 sm:$0xff]  ;;  %v127_v46 = vsel %vm126_vm0, %v124_v45, 0.0  ;;  %v251_v45 = vld [vmem:[%s2341_s7 + $0x18] sm:$0xff] }
  0x1d   :  { %v1941_v42 = vld [vmem:[#allocation8] ss:$0 sm:$0xff] }
  0x1e   :  { %v143_v0 = vstv %s2355_s21  ;;  %239 = vmatpush.msra.mxu0 %v212_v20  ;;  %s1786_s21 = smov 64  }
  0x1f   :  { %v144_v3 = vmul.f32 %v143_v0, %v141_v2  ;;  %v145_v24 = vmul.f32 %v143_v0, %v142_v23 }
  0x20   :  { %v1593_v7 = vpop.eup %1592  ;;  %240 = vmatpush.msra.mxu0 %v211_v21 }
  0x21   :  { %v1905_v4 = vadd.f32 %v144_v3, %v1902_v1  ;;  %v157_v8 = vmul.f32 32.0, %v1593_v7  ;;  %vm161_vm1 = vweird.f32 %v1593_v7  ;;  %v1929_v26 = vadd.f32 %v145_v24, %v1926_v22 }
  0x23   :  { %v150_v5 = vsel %vm126_vm0, %v1905_v4, 0.0  ;;  %v158_v9 = vsub.f32 1.0, %v157_v8  ;;  %v153_v28 = vsel %vm126_vm0, %v1929_v26, 0.0 }
  0x24   :  { %151 = vadd.xlane.f32.xlu0 %v150_v5 }
  0x25   :  { %v159_v10 = vmul.f32 %v1593_v7, %v158_v9  ;;  %v1787_v9 = vmov -1e+30  }
  0x27   :  { %v160_v11 = vadd.f32 %v1593_v7, %v159_v10 }
  0x29   :  { %v1909_v12 = vsel %vm161_vm1, %v1593_v7, %v160_v11  ;;  %v282_v7 = vlaneseq }
  0x2b   :  { %v1969_v8 = vand.u32 127, %v282_v7 }
  0x97   :  { %v152_v13 = vpop.xlane.xlu0 %151 }
  0x98   :  { %v163_v14 = vmul.f32 %v1909_v12, %v152_v13 }
  0x9a   :  { %v165_v15 = vsub.f32 %v1905_v4, %v163_v14 }
  0x9c   :  { %v167_v16 = vmul.f32 %v165_v15, %v165_v15 }
  0x9e   :  { %v169_v17 = vsel %vm126_vm0, %v167_v16, 0.0 }
  0x9f   :  { %170 = vadd.xlane.f32.xlu0 %v169_v17 }
  0xa7   :  { %154 = vadd.xlane.f32.xlu0 %v153_v28 }
 0x112   :  { %v171_v25 = vpop.xlane.xlu0 %170 }
 0x113   :  { %v175_v27 = vmul.f32 %v171_v25, %v1909_v12 }
 0x115   :  { %v177_v29 = vadd.f32 1e-05, %v175_v27 }
 0x117   :  { %1594 = vrsqrt.f32 %v177_v29  ;;  %vm185_vm3 = vweird.f32 %v177_v29 }
 0x11a   :  { %v155_v47 = vpop.xlane.xlu0 %154 }
 0x11b   :  { %v164_v48 = vmul.f32 %v1909_v12, %v155_v47 }
 0x11d   :  { %v1595_v30 = vpop.eup %1594  ;;  %v166_v49 = vsub.f32 %v1929_v26, %v164_v48  ;;  %v125_v48 = vand.u32 2147483647, %v1926_v22 }
 0x11e   :  { %v180_v31 = vmul.f32 %v1595_v30, %v177_v29  ;;  %vm186_vm2 = vweird.f32 %v1595_v30 }
 0x11f   :  { %vm187_vm4 = vmor %vm185_vm3, %vm186_vm2  ;;  %v168_v50 = vmul.f32 %v166_v49, %v166_v49  ;;  %vm755_vm3 = vcmask 523264  }
 0x120   :  { %v181_v32 = vmul.f32 %v1595_v30, %v180_v31 }
 0x121   :  { %v172_v51 = vsel %vm126_vm0, %v168_v50, 0.0 }
 0x122   :  { %v182_v33 = vmul.f32 0.5, %v181_v32  ;;  %173 = vadd.xlane.f32.xlu0 %v172_v51 }
 0x124   :  { %v183_v34 = vsub.f32 1.5, %v182_v33 }
 0x126   :  { %v184_v35 = vmul.f32 %v1595_v30, %v183_v34 }
 0x128   :  { %v188_v37 = vsel %vm187_vm4, %v1595_v30, %v184_v35  ;;  %v1997_v35 = vld [vmem:[%s2341_s7 + $0x8] sm:$0xff] }
 0x129   :  { %v199_v38 = vmul.f32 %v188_v37, %v165_v15 }
 0x12b   :  { %v204_v40 = vmul.f32 %v1574_v36, %v199_v38 }
 0x12d   :  { %v209_v41 = vadd.f32 %v1575_v39, %v204_v40 }
 0x12f   :  { %1487 = vmatmul.msk.f32.vlgmr.msra.gmra.mxu0 %vm126_vm0, %v209_v41 }
 0x195   :  { %v174_v57 = vpop.xlane.xlu0 %173 }
 0x196   :  { %v176_v58 = vmul.f32 %v174_v57, %v1909_v12 }
 0x198   :  { %v178_v59 = vadd.f32 1e-05, %v176_v58 }
 0x19a   :  { %1596 = vrsqrt.f32 %v178_v59  ;;  %vm195_vm6 = vweird.f32 %v178_v59 }
 0x1a0   :  { %v1597_v60 = vpop.eup %1596 }
 0x1a1   :  { %v190_v61 = vmul.f32 %v1597_v60, %v178_v59  ;;  %vm196_vm7 = vweird.f32 %v1597_v60 }
 0x1a2   :  { %vm197_vm8 = vmor %vm195_vm6, %vm196_vm7 }
 0x1a3   :  { %v191_v62 = vmul.f32 %v1597_v60, %v190_v61 }
 0x1a5   :  { %v192_v63 = vmul.f32 0.5, %v191_v62 }
 0x1a7   :  { %v193_v0 = vsub.f32 1.5, %v192_v63 }
 0x1a9   :  { %v194_v1 = vmul.f32 %v1597_v60, %v193_v0 }
 0x1ab   :  { %v198_v2 = vsel %vm197_vm8, %v1597_v60, %v194_v1 }
 0x1ac   :  { %v242_v43 = vpop.f32.mrf.mxu0  ;;  %v200_v3 = vmul.f32 %v198_v2, %v166_v49  ;;  %v130_v49 = vsel %vm126_vm0, %v125_v48, 0.0 }
 0x1ad   :  { %v1944_v44 = vadd.f32 %v1941_v42, %v242_v43 }
 0x1ae   :  { %v205_v5 = vmul.f32 %v1574_v36, %v200_v3  ;;  %v2002_v36 = vld [vmem:[%s2341_s7] sm:$0xff] }
 0x1af   :  { %337 = vrot.lane.b32.xlu2 %v1944_v44, %s1783_s20  ;;  %253 = vrot.lane.b32.xlu1 %v1944_v44, %s1784_s6 }
 0x1b0   :  { %v210_v6 = vadd.f32 %v1575_v39, %v205_v5 }
 0x1b2   :  { %1488 = vmatmul.msk.f32.gmra.mxu0 %vm126_vm0, %v210_v6 }
 0x1b7   :  { %339 = vrot.lane.b32.xlu1 %v1944_v44, %s1785_s18 }
 0x1d8   :  { %128 = vadd.xlane.f32.xlu2 %v127_v46  ;;  %v250_v46 = vld [vmem:[%s2341_s7 + $0x10] sm:$0xff] }
 0x1f0   :  { %311 = vrot.lane.b32.xlu2 %v1944_v44, %s1786_s21 }
 0x209   :  { %v338_v54 = vpop.permute.xlu2 %337 }
 0x221   :  { %v254_v52 = vpop.permute.xlu1 %253 }
 0x222   :  { %1489 = vmatpush.xpose.msk.msra.mxu1 %vm255_vm5, %v254_v52 }
 0x225   :  { %1490 = vmatmul.msk.f32.vlgmr.msra.gmra.mxu1 %vm255_vm5, %v1944_v44 }
 0x229   :  { %v340_v53 = vpop.permute.xlu1 %339 }
 0x22a   :  { %1492 = vmatpush.xpose.msk.msra.mxu3 %vm255_vm5, %v340_v53 }
 0x22d   :  { %1493 = vmatmul.msk.f32.vlgmr.msra.gmra.mxu3 %vm255_vm5, %v338_v54 }
 0x22e   :  { %444 = vmatpush.msrb.mxu3 %v1997_v35 }
 0x22f   :  { %v245_v21 = vpop.f32.mrf.mxu0 }
 0x230   :  { %v1982_v23 = vadd.f32 %v1941_v42, %v245_v21  ;;  %445 = vmatpush.msrb.mxu3 %v2002_v36 }
 0x232   :  { %525 = vrot.lane.b32.xlu2 %v1982_v23, %s1783_s20 }
 0x24b   :  { %v1964_v55 = vpop.xlane.xlu2 %128 }
 0x24c   :  { %vm133_vm9 = vcmp.ne.f32.partialorder %v1964_v55, 0.0 }
 0x24d   :  { %v139_v10 = vsel %vm133_vm9, 0.0, %v1787_v9 }
 0x24e   :  { %v1975_v11 = vperm.slane %v139_v10, %v1969_v8 }
 0x253   :  { %v312_v56 = vpop.permute.xlu2 %311 }
 0x254   :  { %332 = vmatpush.msra.mxu2 %v312_v56 }
 0x25b   :  { %131 = vadd.xlane.f32.xlu2 %v130_v49 }
 0x28c   :  { %v526_v51 = vpop.permute.xlu2 %525 }
 0x2a2   :  { %v277_v13 = vpop.f32.mrf.mxu1 }
 0x2a3   :  { %v280_v14 = vmul.f32 0.25, %v277_v13 }
 0x2a5   :  { %v298_v15 = vadd.f32 %v1975_v11, %v280_v14  ;;  %v2042_v14 = vld [vmem:[%s2342_s8] ss:$0 sm:$0xff] }
 0x2a7   :  { %v300_v16 = vsel %vm299_vm10, %v298_v15, -inf }
 0x2a8   :  { %301 = vmax.xlane.f32.xlu1 %v300_v16 }
 0x2b0   :  { %v362_v17 = vpop.f32.mrf.mxu3 }
 0x2b1   :  { %v365_v18 = vmul.f32 0.25, %v362_v17 }
 0x2b3   :  { %v366_v19 = vadd.f32 %v365_v18, %v1975_v11 }
 0x2b5   :  { %v367_v20 = vsel %vm299_vm10, %v366_v19, -inf }
 0x2b6   :  { %368 = vmax.xlane.f32.xlu0 %v367_v20 }
 0x2c1   :  { %527 = vrot.lane.b32.xlu1 %v1982_v23, %s1785_s18 }
 0x2ce   :  { %v2023_v53 = vpop.xlane.xlu2 %131 }
 0x2cf   :  { %vm134_vm11 = vcmp.ne.f32.partialorder %v2023_v53, 0.0  ;;  %v750_v53 = vld [vmem:[%s2347_s13 + $0x38] sm:$0xff] }
 0x2d0   :  { %v140_v54 = vsel %vm134_vm11, 0.0, %v1787_v9 }
 0x2d1   :  { %v2030_v56 = vperm.slane %v140_v54, %v1969_v8  ;;  %v1579_v54 = vld [vmem:[#allocation9] ss:$0 sm:$0xff] }
 0x31b   :  { %v302_v24 = vpop.xlane.xlu1 %301 }
 0x31c   :  { %v303_v25 = vsub.f32 %v298_v15, %v302_v24 }
 0x31e   :  { %v304_v27 = vmul.f32 1.442695, %v303_v25 }
 0x320   :  { %1598 = vpow2.f32 %v304_v27 }
 0x326   :  { %v1599_v28 = vpop.eup %1598 }
 0x327   :  { %v306_v29 = vsel %vm299_vm10, %v1599_v28, 0.0 }
 0x328   :  { %307 = vadd.xlane.f32.xlu0 %v306_v29 }
 0x329   :  { %v369_v30 = vpop.xlane.xlu0 %368 }
 0x32a   :  { %v370_v31 = vsub.f32 %v366_v19, %v369_v30  ;;  %v1789_v19 = vmov 0.0  }
 0x32b   :  { %v2052_v20 = vsel %vm133_vm9, 1.0, %v1789_v19 }
 0x32c   :  { %v371_v32 = vmul.f32 1.442695, %v370_v31 }
 0x32e   :  { %1600 = vpow2.f32 %v371_v32 }
 0x333   :  { %v528_v37 = vpop.permute.xlu1 %527 }
 0x334   :  { %v1601_v33 = vpop.eup %1600  ;;  %1500 = vmatpush.xpose.msk.msra.mxu3 %vm255_vm5, %v528_v37 }
 0x335   :  { %v373_v34 = vsel %vm299_vm10, %v1601_v33, 0.0 }
 0x336   :  { %374 = vadd.xlane.f32.xlu0 %v373_v34 }
 0x34a   :  { %378 = vrot.lane.b32.xlu0 %v1944_v44, %s1788_s10 }
 0x352   :  { %451 = vrot.lane.b32.xlu0 %v1982_v23, %s1784_s6 }
 0x39b   :  { %v308_v38 = vpop.xlane.xlu0 %307 }
 0x39c   :  { %1602 = vrcp.f32 %v308_v38 }
 0x3a2   :  { %v1603_v39 = vpop.eup %1602 }
 0x3a3   :  { %v310_v40 = vmul.f32 %v1603_v39, %v1599_v28  ;;  %v705_v39 = vld [vmem:[%s2345_s11 + $0x8] sm:$0xff] }
 0x3a5   :  { %1491 = vmatmul.msk.f32.vlgmr.msra.gmra.mxu2 %vm299_vm10, %v310_v40  ;;  %v704_v40 = vld [vmem:[%s2345_s11] sm:$0xff] }
 0x3a9   :  { %v375_v41 = vpop.xlane.xlu0 %374 }
 0x3aa   :  { %1604 = vrcp.f32 %v375_v41 }
 0x3b0   :  { %v1605_v42 = vpop.eup %1604 }
 0x3b1   :  { %v377_v44 = vmul.f32 %v1605_v42, %v1601_v33 }
 0x3bc   :  { %v379_v43 = vpop.permute.xlu0 %378 }
 0x3bd   :  { %399 = vmatpush.msrb.mxu2 %v379_v43 }
 0x3be   :  { %1494 = vmatmul.msk.f32.vlgmr.msrb.gmra.mxu2 %vm299_vm10, %v377_v44 }
 0x3bf   :  { %421 = vmatpush.msra.mxu2 %v251_v45 }
 0x3c1   :  { %422 = vmatpush.msra.mxu2 %v250_v46 }
 0x3c4   :  { %v452_v47 = vpop.permute.xlu0 %451 }
 0x3c5   :  { %1497 = vmatpush.xpose.msk.msrb.mxu2 %vm255_vm5, %v452_v47 }
 0x428   :  { %v334_v50 = vpop.f32.mrf.mxu2 }
 0x429   :  { %1496 = vmatmul.msk.f32.vlgmr.msrb.gmra.mxu3 %vm255_vm5, %v334_v50 }
 0x431   :  { %1501 = vmatmul.msk.f32.vlgmr.msra.gmra.mxu3 %vm255_vm5, %v526_v51  ;;  %v1578_v51 = vld [vmem:[%s2343_s9] ss:$0 sm:$0xff] }
 0x441   :  { %v401_v52 = vpop.f32.mrf.mxu2 }
 0x442   :  { %1495 = vmatmul.msk.f32.vlgmr.msra.gmra.mxu2 %vm255_vm5, %v401_v52 }
 0x443   :  { %609 = vmatpush.msra.mxu2 %v251_v45 }
 0x445   :  { %610 = vmatpush.msra.mxu2 %v250_v46 }
 0x44a   :  { %1498 = vmatmul.msk.f32.vlgmr.msrb.gmra.mxu2 %vm255_vm5, %v1982_v23 }
 0x4ac   :  { %v447_v22 = vpop.f32.mrf.mxu3 }
 0x4b4   :  { %v550_v57 = vpop.f32.mrf.mxu3 }
 0x4b5   :  { %v553_v58 = vmul.f32 0.25, %v550_v57 }
 0x4b7   :  { %v554_v59 = vadd.f32 %v553_v58, %v2030_v56 }
 0x4b9   :  { %v555_v60 = vsel %vm299_vm10, %v554_v59, -inf }
 0x4ba   :  { %556 = vmax.xlane.f32.xlu1 %v555_v60 }
 0x4c5   :  { %v424_v61 = vpop.f32.mrf.mxu2 }
 0x4c6   :  { %v448_v62 = vadd.f32 %v447_v22, %v424_v61 }
 0x4c8   :  { %v642_v15 = vadd.f32 %v2042_v14, %v448_v62 }
 0x4ca   :  { %v644_v17 = vadd.f32 %v642_v15, %v1905_v4  ;;  %v744_v15 = vld [vmem:[%s2347_s13 + $0x8] sm:$0xff] }
 0x4cc   :  { %v2055_v21 = vmul.f32 %v2052_v20, %v644_v17 }
 0x4cd   :  { %v474_v63 = vpop.f32.mrf.mxu2 }
 0x4ce   :  { %v477_v0 = vmul.f32 0.25, %v474_v63  ;;  %v650_v4 = vsel %vm126_vm0, %v2055_v21, 0.0 }
 0x4d0   :  { %v487_v1 = vadd.f32 %v2030_v56, %v477_v0  ;;  %v2090_v0 = vsel %vm134_vm11, 1.0, %v1789_v19 }
 0x4d2   :  { %v488_v2 = vsel %vm299_vm10, %v487_v1, -inf }
 0x4d3   :  { %489 = vmax.xlane.f32.xlu0 %v488_v2 }
 0x4e7   :  { %566 = vrot.lane.b32.xlu0 %v1982_v23, %s1788_s10 }
 0x52d   :  { %v557_v3 = vpop.xlane.xlu1 %556 }
 0x52e   :  { %v558_v5 = vsub.f32 %v554_v59, %v557_v3 }
 0x530   :  { %v559_v6 = vmul.f32 1.442695, %v558_v5 }
 0x532   :  { %1606 = vpow2.f32 %v559_v6 }
 0x538   :  { %v1607_v7 = vpop.eup %1606 }
 0x539   :  { %v561_v8 = vsel %vm299_vm10, %v1607_v7, 0.0 }
 0x53a   :  { %562 = vadd.xlane.f32.xlu2 %v561_v8  ;;  %v749_v8 = vld [vmem:[%s2347_s13 + $0x30] sm:$0xff] }
 0x546   :  { %v490_v9 = vpop.xlane.xlu0 %489 }
 0x547   :  { %v491_v10 = vsub.f32 %v487_v1, %v490_v9  ;;  %v748_v9 = vld [vmem:[%s2347_s13 + $0x28] sm:$0xff] }
 0x549   :  { %v492_v13 = vmul.f32 1.442695, %v491_v10  ;;  %v747_v10 = vld [vmem:[%s2347_s13 + $0x20] sm:$0xff] }
 0x54b   :  { %1608 = vpow2.f32 %v492_v13  ;;  %v746_v13 = vld [vmem:[%s2347_s13 + $0x18] sm:$0xff] }
 0x551   :  { %v1609_v16 = vpop.eup %1608 }
 0x552   :  { %499 = vrot.lane.b32.xlu2 %v1982_v23, %s1786_s21  ;;  %v494_v18 = vsel %vm299_vm10, %v1609_v16, 0.0 }
 0x553   :  { %495 = vadd.xlane.f32.xlu1 %v494_v18  ;;  %v743_v18 = vld [vmem:[%s2347_s13] sm:$0xff] }
 0x559   :  { %v567_v24 = vpop.permute.xlu0 %566 }
 0x55a   :  { %587 = vmatpush.msrb.mxu0 %v567_v24 }
 0x55b   :  { %651 = vadd.xlane.f32.xlu1 %v650_v4 }
 0x5ad   :  { %v563_v25 = vpop.xlane.xlu2 %562 }
 0x5ae   :  { %1610 = vrcp.f32 %v563_v25 }
 0x5b4   :  { %v1611_v23 = vpop.eup %1610 }
 0x5b5   :  { %v500_v27 = vpop.permute.xlu2 %499  ;;  %v565_v28 = vmul.f32 %v1611_v23, %v1607_v7 }
 0x5b6   :  { %520 = vmatpush.msrb.mxu1 %v500_v27 }
 0x5b7   :  { %1502 = vmatmul.msk.f32.vlgmr.msrb.gmra.mxu0 %vm299_vm10, %v565_v28 }
 0x5b8   :  { %632 = vmatpush.msra.mxu1 %v1997_v35  ;;  %v707_v35 = vld [vmem:[%s2345_s11 + $0x18] sm:$0xff] }
 0x5b9   :  { %730 = vmatpush.msra.mxu0 %v707_v35 }
 0x5ba   :  { %633 = vmatpush.msra.mxu1 %v2002_v36  ;;  %v706_v36 = vld [vmem:[%s2345_s11 + $0x10] sm:$0xff] }
 0x5bb   :  { %731 = vmatpush.msra.mxu0 %v706_v36 }
 0x5bd   :  { %732 = vmatpush.msra.mxu0 %v705_v39  ;;  %v1581_v39 = vld [vmem:[%s2348_s14] ss:$0 sm:$0xff] }
 0x5bf   :  { %733 = vmatpush.msra.mxu0 %v704_v40 }
 0x5c1   :  { %770 = vmatpush.msrb.mxu0 %v750_v53  ;;  %v2163_v53 = vld [vmem:[#allocation8 + $0x1] ss:$0 sm:$0xff] }
 0x5c3   :  { %771 = vmatpush.msrb.mxu0 %v749_v8 }
 0x5c5   :  { %772 = vmatpush.msrb.mxu0 %v748_v9 }
 0x5c6   :  { %v496_v55 = vpop.xlane.xlu1 %495 }
 0x5c7   :  { %1612 = vrcp.f32 %v496_v55  ;;  %773 = vmatpush.msrb.mxu0 %v747_v10 }
 0x5c9   :  { %774 = vmatpush.msrb.mxu0 %v746_v13 }
 0x5cd   :  { %v1613_v29 = vpop.eup %1612 }
 0x5ce   :  { %v652_v30 = vpop.xlane.xlu1 %651  ;;  %v498_v31 = vmul.f32 %v1613_v29, %v1609_v16 }
 0x5cf   :  { %v656_v32 = vmul.f32 %v652_v30, %v1909_v12 }
 0x5d0   :  { %1499 = vmatmul.msk.f32.vlgmr.msrb.gmra.mxu1 %vm299_vm10, %v498_v31  ;;  %v1580_v31 = vld [vmem:[%s2346_s12] ss:$0 sm:$0xff] }
 0x5d1   :  { %v658_v33 = vsub.f32 %v2055_v21, %v656_v32 }
 0x5d3   :  { %v660_v34 = vmul.f32 %v658_v33, %v658_v33 }
 0x5d5   :  { %v662_v37 = vsel %vm126_vm0, %v660_v34, 0.0 }
 0x5d6   :  { %663 = vadd.xlane.f32.xlu1 %v662_v37 }
 0x634   :  { %v589_v38 = vpop.f32.mrf.mxu0 }
 0x635   :  { %1503 = vmatmul.msk.f32.vlgmr.msra.gmra.mxu2 %vm255_vm5, %v589_v38 }
 0x649   :  { %v664_v41 = vpop.xlane.xlu1 %663 }
 0x64a   :  { %v668_v42 = vmul.f32 %v664_v41, %v1909_v12 }
 0x64c   :  { %v670_v43 = vadd.f32 1e-05, %v668_v42 }
 0x64d   :  { %v522_v44 = vpop.f32.mrf.mxu1 }
 0x64e   :  { %1614 = vrsqrt.f32 %v670_v43  ;;  %1504 = vmatmul.msk.f32.vlgmr.msra.gmra.mxu1 %vm255_vm5, %v522_v44  ;;  %vm678_vm13 = vweird.f32 %v670_v43 }
 0x654   :  { %v1615_v45 = vpop.eup %1614 }
 0x655   :  { %v673_v46 = vmul.f32 %v1615_v45, %v670_v43  ;;  %vm679_vm12 = vweird.f32 %v1615_v45 }
 0x656   :  { %vm680_vm14 = vmor %vm678_vm13, %vm679_vm12 }
 0x657   :  { %v674_v47 = vmul.f32 %v1615_v45, %v673_v46 }
 0x659   :  { %v675_v48 = vmul.f32 0.5, %v674_v47 }
 0x65b   :  { %v676_v49 = vsub.f32 1.5, %v675_v48 }
 0x65d   :  { %v677_v50 = vmul.f32 %v1615_v45, %v676_v49 }
 0x65f   :  { %v681_v52 = vsel %vm680_vm14, %v1615_v45, %v677_v50  ;;  %v1513_v50 = vld [vmem:[%s2339_s5 + $0x30] sm:$0xff] }
 0x660   :  { %v692_v22 = vmul.f32 %v681_v52, %v658_v33  ;;  %v1511_v52 = vld [vmem:[%s2339_s5 + $0x20] sm:$0xff] }
 0x662   :  { %v697_v57 = vmul.f32 %v1578_v51, %v692_v22 }
 0x664   :  { %v702_v58 = vadd.f32 %v1579_v54, %v697_v57 }
 0x666   :  { %1505 = vmatmul.msk.f32.vlgmr.msra.gmra.mxu0 %vm126_vm0, %v702_v58 }
 0x6b8   :  { %v612_v59 = vpop.f32.mrf.mxu2 }
 0x6cb   :  { %v635_v60 = vpop.f32.mrf.mxu1 }
 0x6cc   :  { %v636_v61 = vadd.f32 %v635_v60, %v612_v59 }
 0x6ce   :  { %v643_v62 = vadd.f32 %v2042_v14, %v636_v61  ;;  %v745_v14 = vld [vmem:[%s2347_s13 + $0x10] sm:$0xff] }
 0x6cf   :  { %775 = vmatpush.msrb.mxu0 %v745_v14 }
 0x6d0   :  { %v645_v63 = vadd.f32 %v643_v62, %v1929_v26 }
 0x6d1   :  { %776 = vmatpush.msrb.mxu0 %v744_v15 }
 0x6d2   :  { %v2093_v1 = vmul.f32 %v2090_v0, %v645_v63 }
 0x6d3   :  { %777 = vmatpush.msrb.mxu0 %v743_v18 }
 0x6d4   :  { %v653_v2 = vsel %vm126_vm0, %v2093_v1, 0.0 }
 0x6d5   :  { %654 = vadd.xlane.f32.xlu0 %v653_v2  ;;  %v1582_v2 = vld [vmem:[%s2337_s3 + $0x1] ss:$0 sm:$0xff] }
 0x6e3   :  { %v735_v33 = vpop.f32.mrf.mxu0 }
 0x6e4   :  { %v736_v34 = vadd.f32 %v1580_v31, %v735_v33 }
 0x6e6   :  { %v741_v37 = vmax.f32 %v736_v34, 0.0 }
 0x748   :  { %v655_v3 = vpop.xlane.xlu0 %654 }
 0x749   :  { %v657_v5 = vmul.f32 %v655_v3, %v1909_v12 }
 0x74b   :  { %v659_v6 = vsub.f32 %v2093_v1, %v657_v5 }
 0x74d   :  { %v661_v7 = vmul.f32 %v659_v6, %v659_v6 }
 0x74f   :  { %v665_v26 = vsel %vm126_vm0, %v661_v7, 0.0 }
 0x750   :  { %666 = vadd.xlane.f32.xlu1 %v665_v26 }
 0x7c3   :  { %v667_v16 = vpop.xlane.xlu1 %666 }
 0x7c4   :  { %v669_v17 = vmul.f32 %v667_v16, %v1909_v12 }
 0x7c6   :  { %v671_v19 = vadd.f32 1e-05, %v669_v17 }
 0x7c8   :  { %1616 = vrsqrt.f32 %v671_v19  ;;  %vm688_vm1 = vweird.f32 %v671_v19 }
 0x7ce   :  { %v1617_v24 = vpop.eup %1616 }
 0x7cf   :  { %v683_v4 = vmul.f32 %v1617_v24, %v671_v19  ;;  %vm689_vm15 = vweird.f32 %v1617_v24 }
 0x7d0   :  { %vm690_vm2 = vmor %vm688_vm1, %vm689_vm15 }
 0x7d1   :  { %v684_v25 = vmul.f32 %v1617_v24, %v683_v4 }
 0x7d3   :  { %v685_v23 = vmul.f32 0.5, %v684_v25 }
 0x7d5   :  { %v686_v27 = vsub.f32 1.5, %v685_v23 }
 0x7d7   :  { %v687_v28 = vmul.f32 %v1617_v24, %v686_v27 }
 0x7d9   :  { %v691_v55 = vsel %vm690_vm2, %v1617_v24, %v687_v28 }
 0x7da   :  { %v693_v29 = vmul.f32 %v691_v55, %v659_v6  ;;  %v1583_v6 = vld [vmem:[%s2338_s4 + $0x1] ss:$0 sm:$0xff] }
 0x7dc   :  { %v698_v30 = vmul.f32 %v1578_v51, %v693_v29  ;;  %v1512_v51 = vld [vmem:[%s2339_s5 + $0x28] sm:$0xff] }
 0x7de   :  { %v703_v32 = vadd.f32 %v1579_v54, %v698_v30 }
 0x7e0   :  { %1506 = vmatmul.msk.f32.gmra.mxu0 %vm126_vm0, %v703_v32 }
 0x7e8   :  { %1507 = vmatmul.msk.f32.vlgmr.msrb.gmra.mxu0 %vm755_vm3, %v741_v37 }
 0x85d   :  { %v738_v38 = vpop.f32.mrf.mxu0 }
 0x85e   :  { %v739_v35 = vadd.f32 %v1580_v31, %v738_v38 }
 0x860   :  { %v742_v36 = vmax.f32 %v739_v35, 0.0 }
 0x862   :  { %1508 = vmatmul.msk.f32.gmra.mxu0 %vm755_vm3, %v742_v36 }
 0x865   :  { %v779_v40 = vpop.f32.mrf.mxu0 }
 0x866   :  { %v780_v41 = vadd.f32 %v1581_v39, %v779_v40 }
 0x868   :  { %v785_v42 = vadd.f32 %v780_v41, %v2055_v21  ;;  %v1514_v21 = vld [vmem:[%s2339_s5 + $0x38] sm:$0xff]  ;;  %s1470_s5 = sshll.u32 %s2351_s17, 4  ;;  %s1471_s5 = int_to_ptr.hbm [resolvable:$true] %s1470_s5 }
 0x869   :  { %875 = vmatpush.msrb.mxu2 %v1514_v21 }
 0x86a   :  { %v2136_v43 = vmul.f32 %v2052_v20, %v785_v42 }
 0x86b   :  { %876 = vmatpush.msrb.mxu2 %v1513_v50 }
 0x86c   :  { %v793_v44 = vsel %vm126_vm0, %v2136_v43, 0.0 }
 0x86d   :  { %794 = vadd.xlane.f32.xlu2 %v793_v44  ;;  %877 = vmatpush.msrb.mxu2 %v1512_v51 }
 0x86f   :  { %878 = vmatpush.msrb.mxu2 %v1511_v52 }
 0x8df   :  { %v782_v10 = vpop.f32.mrf.mxu0 }
 0x8e0   :  { %v795_v45 = vpop.xlane.xlu2 %794  ;;  %v783_v13 = vadd.f32 %v1581_v39, %v782_v10  ;;  %v1517_v10 = vld [vmem:[%s2341_s7 + $0x20] sm:$0xff] }
 0x8e1   :  { %v799_v46 = vmul.f32 %v795_v45, %v1909_v12 }
 0x8e2   :  { %v786_v14 = vadd.f32 %v783_v13, %v2093_v1 }
 0x8e3   :  { %v801_v47 = vsub.f32 %v2136_v43, %v799_v46 }
 0x8e4   :  { %v2176_v15 = vmul.f32 %v2090_v0, %v786_v14 }
 0x8e5   :  { %v803_v48 = vmul.f32 %v801_v47, %v801_v47 }
 0x8e6   :  { %v796_v16 = vsel %vm126_vm0, %v2176_v15, 0.0 }
 0x8e7   :  { %v805_v49 = vsel %vm126_vm0, %v803_v48, 0.0 }
 0x8e8   :  { %806 = vadd.xlane.f32.xlu1 %v805_v49 }
 0x95b   :  { %v807_v22 = vpop.xlane.xlu1 %806 }
 0x95c   :  { %v811_v54 = vmul.f32 %v807_v22, %v1909_v12 }
 0x95e   :  { %v813_v57 = vadd.f32 1e-05, %v811_v54 }
 0x960   :  { %1618 = vrsqrt.f32 %v813_v57  ;;  %vm821_vm6 = vweird.f32 %v813_v57 }
 0x966   :  { %v1619_v58 = vpop.eup %1618 }
 0x967   :  { %v816_v59 = vmul.f32 %v1619_v58, %v813_v57  ;;  %vm822_vm4 = vweird.f32 %v1619_v58 }
 0x968   :  { %vm823_vm7 = vmor %vm821_vm6, %vm822_vm4 }
 0x969   :  { %v817_v60 = vmul.f32 %v1619_v58, %v816_v59 }
 0x96b   :  { %v818_v61 = vmul.f32 0.5, %v817_v60 }
 0x96d   :  { %v819_v62 = vsub.f32 1.5, %v818_v61 }
 0x96f   :  { %v820_v63 = vmul.f32 %v1619_v58, %v819_v62 }
 0x971   :  { %v824_v3 = vsel %vm823_vm7, %v1619_v58, %v820_v63 }
 0x972   :  { %v835_v5 = vmul.f32 %v824_v3, %v801_v47  ;;  %v1519_v3 = vld [vmem:[%s2341_s7 + $0x30] sm:$0xff] }
 0x974   :  { %v840_v7 = vmul.f32 %v1582_v2, %v835_v5 }
 0x976   :  { %v845_v26 = vadd.f32 %v1583_v6, %v840_v7 }
 0x978   :  { %1515 = vmatmul.msk.f32.vlgmr.msrb.gmra.mxu2 %vm126_vm0, %v845_v26 }
 0x9fb   :  { %v880_v8 = vpop.f32.mrf.mxu2 }
 0x9fc   :  { %v2166_v9 = vadd.f32 %v2163_v53, %v880_v8 }
 0x9fe   :  { %892 = vrot.lane.b32.xlu2 %v2166_v9, %s1784_s6  ;;  %957 = vrot.lane.b32.xlu0 %v2166_v9, %s1783_s20 }
 0x9ff   :  { %959 = vrot.lane.b32.xlu1 %v2166_v9, %s1785_s18 }
 0xa29   :  { %797 = vadd.xlane.f32.xlu1 %v796_v16 }
 0xa58   :  { %v893_v17 = vpop.permute.xlu2 %892 }
 0xa59   :  { %1521 = vmatpush.xpose.msk.msrb.mxu1 %vm255_vm5, %v893_v17 }
 0xa5c   :  { %1522 = vmatmul.msk.f32.vlgmr.msrb.gmra.mxu1 %vm255_vm5, %v2166_v9 }
 0xa70   :  { %v958_v19 = vpop.permute.xlu0 %957 }
 0xa71   :  { %v960_v18 = vpop.permute.xlu1 %959 }
 0xa72   :  { %1524 = vmatpush.xpose.msk.msrb.mxu3 %vm255_vm5, %v960_v18 }
 0xa75   :  { %1525 = vmatmul.msk.f32.vlgmr.msrb.gmra.mxu3 %vm255_vm5, %v958_v19 }
 0xa9c   :  { %v798_v1 = vpop.xlane.xlu1 %797 }
 0xa9d   :  { %v800_v24 = vmul.f32 %v798_v1, %v1909_v12 }
 0xa9f   :  { %v802_v4 = vsub.f32 %v2176_v15, %v800_v24 }
 0xaa1   :  { %v804_v25 = vmul.f32 %v802_v4, %v802_v4 }
 0xaa3   :  { %v808_v23 = vsel %vm126_vm0, %v804_v25, 0.0 }
 0xaa4   :  { %809 = vadd.xlane.f32.xlu0 %v808_v23 }
 0xad9   :  { %v915_v27 = vpop.f32.mrf.mxu1 }
 0xada   :  { %v918_v28 = vmul.f32 0.25, %v915_v27 }
 0xadc   :  { %v919_v55 = vadd.f32 %v918_v28, %v1975_v11 }
 0xade   :  { %v920_v29 = vsel %vm299_vm10, %v919_v55, -inf }
 0xadf   :  { %921 = vmax.xlane.f32.xlu0 %v920_v29 }
 0xaf8   :  { %v982_v30 = vpop.f32.mrf.mxu3 }
 0xaf9   :  { %v985_v31 = vmul.f32 0.25, %v982_v30 }
 0xafb   :  { %v986_v32 = vadd.f32 %v985_v31, %v1975_v11 }
 0xafd   :  { %v987_v33 = vsel %vm299_vm10, %v986_v32, -inf }
 0xafe   :  { %988 = vmax.xlane.f32.xlu2 %v987_v33 }
 0xb16   :  { %931 = vrot.lane.b32.xlu2 %v2166_v9, %s1786_s21 }
 0xb17   :  { %v810_v34 = vpop.xlane.xlu0 %809 }
 0xb18   :  { %v812_v37 = vmul.f32 %v810_v34, %v1909_v12 }
 0xb1a   :  { %v814_v38 = vadd.f32 1e-05, %v812_v37 }
 0xb1c   :  { %1620 = vrsqrt.f32 %v814_v38  ;;  %vm831_vm9 = vweird.f32 %v814_v38 }
 0xb22   :  { %v1621_v35 = vpop.eup %1620 }
 0xb23   :  { %v826_v36 = vmul.f32 %v1621_v35, %v814_v38  ;;  %vm832_vm8 = vweird.f32 %v1621_v35  ;;  %v1585_v38 = vld [vmem:[%s2342_s8 + $0x1] ss:$0 sm:$0xff] }
 0xb24   :  { %vm833_vm11 = vmor %vm831_vm9, %vm832_vm8 }
 0xb25   :  { %v827_v39 = vmul.f32 %v1621_v35, %v826_v36 }
 0xb27   :  { %v828_v40 = vmul.f32 0.5, %v827_v39 }
 0xb29   :  { %v829_v41 = vsub.f32 1.5, %v828_v40 }
 0xb2b   :  { %v830_v42 = vmul.f32 %v1621_v35, %v829_v41 }
 0xb2d   :  { %v834_v11 = vsel %vm833_vm11, %v1621_v35, %v830_v42 }
 0xb2e   :  { %v836_v44 = vmul.f32 %v834_v11, %v802_v4 }
 0xb30   :  { %v841_v45 = vmul.f32 %v1582_v2, %v836_v44  ;;  %v1520_v2 = vld [vmem:[%s2341_s7 + $0x38] sm:$0xff] }
 0xb32   :  { %v846_v46 = vadd.f32 %v1583_v6, %v841_v45 }
 0xb34   :  { %1516 = vmatmul.msk.f32.gmra.mxu2 %vm126_vm0, %v846_v46 }
 0xb52   :  { %v922_v47 = vpop.xlane.xlu0 %921 }
 0xb53   :  { %v923_v48 = vsub.f32 %v919_v55, %v922_v47 }
 0xb55   :  { %v924_v49 = vmul.f32 1.442695, %v923_v48 }
 0xb57   :  { %1622 = vpow2.f32 %v924_v49 }
 0xb5d   :  { %v1623_v21 = vpop.eup %1622 }
 0xb5e   :  { %v926_v50 = vsel %vm299_vm10, %v1623_v21, 0.0 }
 0xb5f   :  { %927 = vadd.xlane.f32.xlu0 %v926_v50 }
 0xb71   :  { %v989_v51 = vpop.xlane.xlu2 %988 }
 0xb72   :  { %v990_v52 = vsub.f32 %v986_v32, %v989_v51 }
 0xb74   :  { %v991_v22 = vmul.f32 1.442695, %v990_v52 }
 0xb76   :  { %1624 = vpow2.f32 %v991_v22 }
 0xb79   :  { %v932_v54 = vpop.permute.xlu2 %931 }
 0xb7a   :  { %952 = vmatpush.msra.mxu1 %v932_v54 }
 0xb7c   :  { %v1625_v57 = vpop.eup %1624  ;;  %1041 = vmatpush.msrb.mxu1 %v1520_v2 }
 0xb7d   :  { %v993_v58 = vsel %vm299_vm10, %v1625_v57, 0.0 }
 0xb7e   :  { %994 = vadd.xlane.f32.xlu1 %v993_v58  ;;  %1042 = vmatpush.msrb.mxu1 %v1519_v3 }
 0xb97   :  { %998 = vrot.lane.b32.xlu1 %v2166_v9, %s1788_s10 }
 0xbb7   :  { %v883_v59 = vpop.f32.mrf.mxu2 }
 0xbb8   :  { %v884_v60 = vadd.f32 %v2163_v53, %v883_v59  ;;  %v1518_v53 = vld [vmem:[%s2341_s7 + $0x28] sm:$0xff] }
 0xbb9   :  { %1064 = vmatpush.msra.mxu3 %v1518_v53 }
 0xbba   :  { %1071 = vrot.lane.b32.xlu1 %v884_v60, %s1784_s6  ;;  %1138 = vrot.lane.b32.xlu0 %v884_v60, %s1785_s18 }
 0xbbb   :  { %1065 = vmatpush.msra.mxu3 %v1517_v10 }
 0xbc2   :  { %1136 = vrot.lane.b32.xlu1 %v884_v60, %s1783_s20 }
 0xbd2   :  { %v928_v61 = vpop.xlane.xlu0 %927 }
 0xbd3   :  { %1626 = vrcp.f32 %v928_v61 }
 0xbd9   :  { %v1627_v62 = vpop.eup %1626 }
 0xbda   :  { %v930_v63 = vmul.f32 %v1627_v62, %v1623_v21 }
 0xbdc   :  { %1523 = vmatmul.msk.f32.vlgmr.msra.gmra.mxu1 %vm299_vm10, %v930_v63 }
 0xbf1   :  { %v995_v5 = vpop.xlane.xlu1 %994 }
 0xbf2   :  { %1628 = vrcp.f32 %v995_v5 }
 0xbf8   :  { %v1629_v6 = vpop.eup %1628 }
 0xbf9   :  { %v997_v7 = vmul.f32 %v1629_v6, %v1625_v57 }
 0xc09   :  { %v999_v26 = vpop.permute.xlu1 %998 }
 0xc0a   :  { %1019 = vmatpush.msra.mxu2 %v999_v26  ;;  %v1539_v26 = vld [vmem:[%s2345_s11 + $0x20] sm:$0xff] }
 0xc0b   :  { %1526 = vmatmul.msk.f32.vlgmr.msra.gmra.mxu2 %vm299_vm10, %v997_v7  ;;  %v1540_v7 = vld [vmem:[%s2345_s11 + $0x28] sm:$0xff] }
 0xc2c   :  { %v1139_v8 = vpop.permute.xlu0 %1138  ;;  %v1072_v9 = vpop.permute.xlu1 %1071 }
 0xc2d   :  { %1529 = vmatpush.xpose.msk.msra.mxu0 %vm255_vm5, %v1072_v9  ;;  %1532 = vmatpush.xpose.msk.msra.mxu1 %vm255_vm5, %v1139_v8 }
 0xc30   :  { %1530 = vmatmul.msk.f32.vlgmr.msra.gmra.mxu0 %vm255_vm5, %v884_v60 }
 0xc31   :  { %1220 = vmatpush.msrb.mxu0 %v1520_v2 }
 0xc33   :  { %1221 = vmatpush.msrb.mxu0 %v1519_v3  ;;  %v1542_v3 = vld [vmem:[%s2345_s11 + $0x38] sm:$0xff] }
 0xc34   :  { %v1137_v16 = vpop.permute.xlu1 %1136 }
 0xc59   :  { %v954_v13 = vpop.f32.mrf.mxu1 }
 0xc5a   :  { %1528 = vmatmul.msk.f32.vlgmr.msra.gmra.mxu3 %vm255_vm5, %v954_v13 }
 0xc8e   :  { %v1021_v14 = vpop.f32.mrf.mxu2 }
 0xc8f   :  { %1527 = vmatmul.msk.f32.vlgmr.msrb.gmra.mxu1 %vm255_vm5, %v1021_v14 }
 0xc90   :  { %1346 = vmatpush.msrb.mxu1 %v1542_v3 }
 0xc97   :  { %1533 = vmatmul.msk.f32.vlgmr.msra.gmra.mxu1 %vm255_vm5, %v1137_v16 }
 0xcad   :  { %v1094_v17 = vpop.f32.mrf.mxu0 }
 0xcae   :  { %v1097_v18 = vmul.f32 0.25, %v1094_v17 }
 0xcb0   :  { %v1098_v19 = vadd.f32 %v1097_v18, %v2030_v56 }
 0xcb2   :  { %v1099_v1 = vsel %vm299_vm10, %v1098_v19, -inf }
 0xcb3   :  { %1100 = vmax.xlane.f32.xlu1 %v1099_v1 }
 0xcdd   :  { %v1067_v34 = vpop.f32.mrf.mxu3 }
 0xd0c   :  { %v1044_v24 = vpop.f32.mrf.mxu1 }
 0xd14   :  { %v1161_v4 = vpop.f32.mrf.mxu1 }
 0xd15   :  { %v1164_v25 = vmul.f32 0.25, %v1161_v4  ;;  %v1586_v4 = vld [vmem:[%s2343_s9 + $0x1] ss:$0 sm:$0xff] }
 0xd17   :  { %v1165_v23 = vadd.f32 %v1164_v25, %v2030_v56  ;;  %v1068_v56 = vadd.f32 %v1067_v34, %v1044_v24 }
 0xd19   :  { %v1166_v27 = vsel %vm299_vm10, %v1165_v23, -inf  ;;  %v1254_v35 = vadd.f32 %v1585_v38, %v1068_v56 }
 0xd1a   :  { %1167 = vmax.xlane.f32.xlu2 %v1166_v27  ;;  %v1587_v27 = vld [vmem:[#allocation9 + $0x1] ss:$0 sm:$0xff] }
 0xd1b   :  { %v1256_v40 = vadd.f32 %v1254_v35, %v2136_v43  ;;  %v1547_v35 = vld [vmem:[%s2347_s13 + $0x48] sm:$0xff] }
 0xd1d   :  { %v2237_v42 = vmul.f32 %v2052_v20, %v1256_v40 }
 0xd1f   :  { %v1264_v11 = vsel %vm126_vm0, %v2237_v42, 0.0 }
 0xd26   :  { %v1101_v28 = vpop.xlane.xlu1 %1100 }
 0xd27   :  { %v1102_v55 = vsub.f32 %v1098_v19, %v1101_v28 }
 0xd29   :  { %v1103_v29 = vmul.f32 1.442695, %v1102_v55 }
 0xd2b   :  { %1630 = vpow2.f32 %v1103_v29  ;;  %v1553_v29 = vld [vmem:[%s2347_s13 + $0x78] sm:$0xff] }
 0xd31   :  { %v1631_v30 = vpop.eup %1630 }
 0xd32   :  { %1110 = vrot.lane.b32.xlu2 %v884_v60, %s1786_s21  ;;  %v1105_v31 = vsel %vm299_vm10, %v1631_v30, 0.0 }
 0xd33   :  { %1106 = vadd.xlane.f32.xlu0 %v1105_v31  ;;  %v1551_v31 = vld [vmem:[%s2347_s13 + $0x68] sm:$0xff] }
 0xd47   :  { %1177 = vrot.lane.b32.xlu0 %v884_v60, %s1788_s10 }
 0xd8d   :  { %v1168_v32 = vpop.xlane.xlu2 %1167 }
 0xd8e   :  { %v1169_v33 = vsub.f32 %v1165_v23, %v1168_v32 }
 0xd90   :  { %v1170_v37 = vmul.f32 1.442695, %v1169_v33  ;;  %v1550_v33 = vld [vmem:[%s2347_s13 + $0x60] sm:$0xff] }
 0xd92   :  { %1632 = vpow2.f32 %v1170_v37  ;;  %v1549_v37 = vld [vmem:[%s2347_s13 + $0x58] sm:$0xff] }
 0xd95   :  { %v1111_v36 = vpop.permute.xlu2 %1110 }
 0xd96   :  { %1131 = vmatpush.msrb.mxu2 %v1111_v36  ;;  %v1546_v36 = vld [vmem:[%s2347_s13 + $0x40] sm:$0xff] }
 0xd98   :  { %1243 = vmatpush.msra.mxu2 %v1518_v53  ;;  %v1633_v39 = vpop.eup %1632 }
 0xd99   :  { %v1172_v41 = vsel %vm299_vm10, %v1633_v39, 0.0 }
 0xd9a   :  { %1244 = vmatpush.msra.mxu2 %v1517_v10  ;;  %1173 = vadd.xlane.f32.xlu1 %v1172_v41 }
 0xda2   :  { %1265 = vadd.xlane.f32.xlu1 %v1264_v11 }
 0xda6   :  { %v1107_v44 = vpop.xlane.xlu0 %1106 }
 0xda7   :  { %1634 = vrcp.f32 %v1107_v44 }
 0xdad   :  { %v1635_v45 = vpop.eup %1634 }
 0xdae   :  { %v1109_v46 = vmul.f32 %v1635_v45, %v1631_v30  ;;  %v1552_v30 = vld [vmem:[%s2347_s13 + $0x70] sm:$0xff] }
 0xdb0   :  { %1531 = vmatmul.msk.f32.vlgmr.msrb.gmra.mxu2 %vm299_vm10, %v1109_v46 }
 0xdb9   :  { %v1178_v47 = vpop.permute.xlu0 %1177 }
 0xdba   :  { %1198 = vmatpush.msrb.mxu3 %v1178_v47 }
 0xdbc   :  { %1387 = vmatpush.msra.mxu3 %v1553_v29 }
 0xdbe   :  { %1388 = vmatpush.msra.mxu3 %v1552_v30 }
 0xdc0   :  { %1389 = vmatpush.msra.mxu3 %v1551_v31 }
 0xdc2   :  { %1390 = vmatpush.msra.mxu3 %v1550_v33 }
 0xdc4   :  { %1391 = vmatpush.msra.mxu3 %v1549_v37 }
 0xe0d   :  { %v1174_v43 = vpop.xlane.xlu1 %1173 }
 0xe0e   :  { %1636 = vrcp.f32 %v1174_v43 }
 0xe14   :  { %v1637_v48 = vpop.eup %1636 }
 0xe15   :  { %v1176_v49 = vmul.f32 %v1637_v48, %v1633_v39  ;;  %v1266_v54 = vpop.xlane.xlu1 %1265 }
 0xe16   :  { %v1270_v58 = vmul.f32 %v1266_v54, %v1909_v12 }
 0xe17   :  { %1534 = vmatmul.msk.f32.vlgmr.msrb.gmra.mxu3 %vm299_vm10, %v1176_v49  ;;  %v1588_v49 = vld [vmem:[%s2346_s12 + $0x1] ss:$0 sm:$0xff] }
 0xe18   :  { %v1272_v61 = vsub.f32 %v2237_v42, %v1270_v58 }
 0xe1a   :  { %v1274_v63 = vmul.f32 %v1272_v61, %v1272_v61 }
 0xe1c   :  { %v1276_v2 = vsel %vm126_vm0, %v1274_v63, 0.0 }
 0xe33   :  { %v1133_v21 = vpop.f32.mrf.mxu2 }
 0xe34   :  { %1536 = vmatmul.msk.f32.vlgmr.msra.gmra.mxu2 %vm255_vm5, %v1133_v21 }
 0xe9a   :  { %v1200_v50 = vpop.f32.mrf.mxu3 }
 0xe9b   :  { %1535 = vmatmul.msk.f32.vlgmr.msrb.gmra.mxu0 %vm255_vm5, %v1200_v50 }
 0xeb7   :  { %v1246_v51 = vpop.f32.mrf.mxu2 }
 0xf18   :  { %v1223_v52 = vpop.f32.mrf.mxu0 }
 0xf19   :  { %v1247_v22 = vadd.f32 %v1246_v51, %v1223_v52 }
 0xf1b   :  { %v1255_v57 = vadd.f32 %v1585_v38, %v1247_v22  ;;  %v1548_v38 = vld [vmem:[%s2347_s13 + $0x50] sm:$0xff] }
 0xf1c   :  { %1392 = vmatpush.msra.mxu3 %v1548_v38 }
 0xf1d   :  { %v1257_v59 = vadd.f32 %v1255_v57, %v2176_v15  ;;  %v1541_v15 = vld [vmem:[%s2345_s11 + $0x30] sm:$0xff]  ;;  %v1589_v57 = vld [vmem:[%s2348_s14 + $0x1] ss:$0 sm:$0xff] }
 0xf1e   :  { %1347 = vmatpush.msrb.mxu1 %v1541_v15  ;;  %1393 = vmatpush.msra.mxu3 %v1547_v35 }
 0xf1f   :  { %v2248_v60 = vmul.f32 %v2090_v0, %v1257_v59 }
 0xf20   :  { %1348 = vmatpush.msrb.mxu1 %v1540_v7  ;;  %1394 = vmatpush.msra.mxu3 %v1546_v36 }
 0xf21   :  { %v1267_v62 = vsel %vm126_vm0, %v2248_v60, 0.0 }
 0xf22   :  { %1268 = vadd.xlane.f32.xlu1 %v1267_v62  ;;  %1349 = vmatpush.msrb.mxu1 %v1539_v26 }
 0xf2a   :  { %1277 = vadd.xlane.f32.xlu1 %v1276_v2 }
 0xf95   :  { %v1269_v5 = vpop.xlane.xlu1 %1268 }
 0xf96   :  { %v1271_v6 = vmul.f32 %v1269_v5, %v1909_v12 }
 0xf98   :  { %v1273_v53 = vsub.f32 %v2248_v60, %v1271_v6 }
 0xf9a   :  { %v1275_v8 = vmul.f32 %v1273_v53, %v1273_v53 }
 0xf9c   :  { %v1279_v9 = vsel %vm126_vm0, %v1275_v8, 0.0 }
 0xf9d   :  { %1280 = vadd.xlane.f32.xlu0 %v1279_v9  ;;  %v1278_v10 = vpop.xlane.xlu1 %1277 }
 0xf9e   :  { %v1282_v13 = vmul.f32 %v1278_v10, %v1909_v12 }
 0xfa0   :  { %v1284_v14 = vadd.f32 1e-05, %v1282_v13 }
 0xfa2   :  { %1638 = vrsqrt.f32 %v1284_v14  ;;  %vm1292_vm10 = vweird.f32 %v1284_v14 }
 0xfa8   :  { %v1639_v16 = vpop.eup %1638 }
 0xfa9   :  { %v1287_v17 = vmul.f32 %v1639_v16, %v1284_v14  ;;  %vm1293_vm5 = vweird.f32 %v1639_v16 }
 0xfaa   :  { %vm1294_vm12 = vmor %vm1292_vm10, %vm1293_vm5 }
 0xfab   :  { %v1288_v18 = vmul.f32 %v1639_v16, %v1287_v17 }
 0xfad   :  { %v1289_v19 = vmul.f32 0.5, %v1288_v18 }
 0xfaf   :  { %v1290_v1 = vsub.f32 1.5, %v1289_v19 }
 0xfb1   :  { %v1291_v24 = vmul.f32 %v1639_v16, %v1290_v1 }
 0xfb3   :  { %v1295_v25 = vsel %vm1294_vm12, %v1639_v16, %v1291_v24 }
 0xfb4   :  { %v1306_v23 = vmul.f32 %v1295_v25, %v1272_v61  ;;  %v1590_v25 = vld [vmem:[%s2349_s15] ss:$0 sm:$0xff]  ;;  %s1790_s15 = smov [#allocation11]  }
 0xfb6   :  { %v1311_v28 = vmul.f32 %v1586_v4, %v1306_v23 }
 0xfb8   :  { %v1316_v55 = vadd.f32 %v1587_v27, %v1311_v28  ;;  %v1591_v28 = vld [vmem:[%s2350_s16] ss:$0 sm:$0xff]  ;;  %s1468_s16 = sshll.u32 %s1790_s15, 4  ;;  %s1469_s16 = int_to_ptr.vmem [resolvable:$true] %s1468_s16 }
 0xfba   :  { %1544 = vmatmul.msk.f32.vlgmr.msrb.gmra.mxu1 %vm126_vm0, %v1316_v55 }
0x1010   :  { %v1281_v32 = vpop.xlane.xlu0 %1280 }
0x1011   :  { %v1283_v34 = vmul.f32 %v1281_v32, %v1909_v12 }
0x1013   :  { %v1285_v56 = vadd.f32 1e-05, %v1283_v34 }
0x1015   :  { %1640 = vrsqrt.f32 %v1285_v56  ;;  %vm1302_vm14 = vweird.f32 %v1285_v56 }
0x101b   :  { %v1641_v39 = vpop.eup %1640 }
0x101c   :  { %v1297_v40 = vmul.f32 %v1641_v39, %v1285_v56  ;;  %vm1303_vm13 = vweird.f32 %v1641_v39 }
0x101d   :  { %vm1304_vm15 = vmor %vm1302_vm14, %vm1303_vm13 }
0x101e   :  { %v1298_v41 = vmul.f32 %v1641_v39, %v1297_v40 }
0x1020   :  { %v1299_v11 = vmul.f32 0.5, %v1298_v41 }
0x1022   :  { %v1300_v44 = vsub.f32 1.5, %v1299_v11 }
0x1024   :  { %v1301_v45 = vmul.f32 %v1641_v39, %v1300_v44 }
0x1026   :  { %v1305_v46 = vsel %vm1304_vm15, %v1641_v39, %v1301_v45 }
0x1027   :  { %v1307_v47 = vmul.f32 %v1305_v46, %v1273_v53 }
0x1029   :  { %v1312_v43 = vmul.f32 %v1586_v4, %v1307_v47 }
0x102b   :  { %v1317_v48 = vadd.f32 %v1587_v27, %v1312_v43 }
0x102d   :  { %1545 = vmatmul.msk.f32.gmra.mxu1 %vm126_vm0, %v1317_v48 }
0x1037   :  { %v1351_v21 = vpop.f32.mrf.mxu1 }
0x1038   :  { %v1352_v50 = vadd.f32 %v1588_v49, %v1351_v21 }
0x103a   :  { %v1357_v51 = vmax.f32 %v1352_v50, 0.0 }
0x103c   :  { %1555 = vmatmul.msk.f32.vlgmr.msra.gmra.mxu3 %vm755_vm3, %v1357_v51 }
0x10aa   :  { %v1354_v52 = vpop.f32.mrf.mxu1 }
0x10ab   :  { %v1355_v22 = vadd.f32 %v1588_v49, %v1354_v52 }
0x10ad   :  { %v1358_v54 = vmax.f32 %v1355_v22, 0.0 }
0x10af   :  { %1556 = vmatmul.msk.f32.gmra.mxu3 %vm755_vm3, %v1358_v54 }
0x10bf   :  { %v1396_v58 = vpop.f32.mrf.mxu3 }
0x10c0   :  { %v1397_v59 = vadd.f32 %v1589_v57, %v1396_v58 }
0x10c2   :  { %v1402_v61 = vadd.f32 %v1397_v59, %v2237_v42 }
0x10c4   :  { %v1404_v62 = vmul.f32 %v2052_v20, %v1402_v61 }
0x10c6   :  { %v1408_v63 = vsel %vm126_vm0, %v1404_v62, 0.0 }
0x10c7   :  { %1409 = vadd.xlane.f32.xlu2 %v1408_v63 }
0x1132   :  { %v1399_v2 = vpop.f32.mrf.mxu3 }
0x1133   :  { %v1400_v3 = vadd.f32 %v1589_v57, %v1399_v2 }
0x1135   :  { %v1403_v15 = vadd.f32 %v1400_v3, %v2248_v60 }
0x1137   :  { %v1405_v5 = vmul.f32 %v2090_v0, %v1403_v15 }
0x1139   :  { %v1411_v6 = vsel %vm126_vm0, %v1405_v5, 0.0 }
0x113a   :  { %1412 = vadd.xlane.f32.xlu1 %v1411_v6  ;;  %v1410_v7 = vpop.xlane.xlu2 %1409 }
0x113b   :  { %v1414_v26 = vmul.f32 %v1410_v7, %v1909_v12 }
0x113d   :  { %v1416_v53 = vsub.f32 %v1404_v62, %v1414_v26 }
0x113f   :  { %v1418_v8 = vmul.f32 %v1416_v53, %v1416_v53 }
0x1141   :  { %v1420_v42 = vsel %vm126_vm0, %v1418_v8, 0.0 }
0x1142   :  { %1421 = vadd.xlane.f32.xlu1 %v1420_v42 }
0x11ad   :  { %v1413_v20 = vpop.xlane.xlu1 %1412 }
0x11ae   :  { %v1415_v9 = vmul.f32 %v1413_v20, %v1909_v12 }
0x11b0   :  { %v1417_v10 = vsub.f32 %v1405_v5, %v1415_v9 }
0x11b2   :  { %v1419_v13 = vmul.f32 %v1417_v10, %v1417_v10 }
0x11b4   :  { %v1423_v60 = vsel %vm126_vm0, %v1419_v13, 0.0 }
0x11b5   :  { %1424 = vadd.xlane.f32.xlu1 %v1423_v60  ;;  %v1422_v0 = vpop.xlane.xlu1 %1421 }
0x11b6   :  { %v1426_v14 = vmul.f32 %v1422_v0, %v1909_v12 }
0x11b8   :  { %v1428_v16 = vadd.f32 1e-05, %v1426_v14 }
0x11ba   :  { %1642 = vrsqrt.f32 %v1428_v16  ;;  %vm1436_vm2 = vweird.f32 %v1428_v16 }
0x11c0   :  { %v1643_v17 = vpop.eup %1642 }
0x11c1   :  { %v1431_v18 = vmul.f32 %v1643_v17, %v1428_v16  ;;  %vm1437_vm1 = vweird.f32 %v1643_v17 }
0x11c2   :  { %vm1438_vm3 = vmor %vm1436_vm2, %vm1437_vm1 }
0x11c3   :  { %v1432_v19 = vmul.f32 %v1643_v17, %v1431_v18 }
0x11c5   :  { %v1433_v1 = vmul.f32 0.5, %v1432_v19 }
0x11c7   :  { %v1434_v24 = vsub.f32 1.5, %v1433_v1 }
0x11c9   :  { %v1435_v4 = vmul.f32 %v1643_v17, %v1434_v24 }
0x11cb   :  { %v1439_v23 = vsel %vm1438_vm3, %v1643_v17, %v1435_v4 }
0x11cc   :  { %v1450_v27 = vmul.f32 %v1439_v23, %v1416_v53 }
0x11ce   :  { %v1455_v55 = vmul.f32 %v1590_v25, %v1450_v27 }
0x11d0   :  { %v1460_v29 = vadd.f32 %v1591_v28, %v1455_v55 }
0x11d2   :  { %1462 = vst.msk [vmem:[#allocation11] sm:$0xff] %vm126_vm0, %v1460_v29 }
0x1228   :  { %v1425_v30 = vpop.xlane.xlu1 %1424 }
0x1229   :  { %v1427_v31 = vmul.f32 %v1425_v30, %v1909_v12 }
0x122b   :  { %v1429_v32 = vadd.f32 1e-05, %v1427_v31 }
0x122d   :  { %1644 = vrsqrt.f32 %v1429_v32  ;;  %vm1446_vm6 = vweird.f32 %v1429_v32 }
0x1233   :  { %v1645_v33 = vpop.eup %1644 }
0x1234   :  { %v1441_v34 = vmul.f32 %v1645_v33, %v1429_v32  ;;  %vm1447_vm4 = vweird.f32 %v1645_v33 }
0x1235   :  { %vm1448_vm7 = vmor %vm1446_vm6, %vm1447_vm4 }
0x1236   :  { %v1442_v37 = vmul.f32 %v1645_v33, %v1441_v34 }
0x1238   :  { %v1443_v56 = vmul.f32 0.5, %v1442_v37 }
0x123a   :  { %v1444_v38 = vsub.f32 1.5, %v1443_v56 }
0x123c   :  { %v1445_v35 = vmul.f32 %v1645_v33, %v1444_v38 }
0x123e   :  { %v1449_v36 = vsel %vm1448_vm7, %v1645_v33, %v1445_v35 }
0x123f   :  { %v1451_v39 = vmul.f32 %v1449_v36, %v1417_v10 }
0x1241   :  { %v1456_v12 = vmul.f32 %v1590_v25, %v1451_v39 }
0x1243   :  { %v1461_v40 = vadd.f32 %v1591_v28, %v1456_v12 }
0x1245   :  { %1463 = vst.msk [vmem:[#allocation11 + $0x8] sm:$0xff] %vm126_vm0, %v1461_v40 }
0x1246   :  { %1476 = dma.vmem_to_hbm [thread:$0]  %s1469_s16, 256, %s1471_s5, [#allocation5], %s1775_s19, %s1775_s19, %s1776_s1  }
0x1247   :  { %1772 = dma.done.wait [#allocation5], 256  }
0x1248   :  { %1773 = vsyncadd [#allocation5], 4294967040 }
0x1249   :  { %1481 = vsyncpa [#allocation4], 1 }
0x124a   :  { %1482 = vsyncpa [#allocation7], 1 }
0x124b   :  { %1483 = vsyncpa [#allocation10], 1 }
0x124c   :  { %1484 = vsyncpa [#allocation5], 1 }

</bundles_post_ra>
